<compile_context>
chip_gen: v7x
topology: tpu7x:2x2x1
jax: 0.10.0
libtpu: 0.0.40
codegen_flags: <defaults>
</compile_context>

<pallas_src>
from functools import partial

import jax
import jax.numpy as jnp
from jax.experimental import pallas as pl
from jax.experimental.pallas import tpu as pltpu


# ------------------------------ helpers --------------------------------------

def _softmax(x, axis):
    m = jnp.max(x, axis=axis, keepdims=True)
    e = jnp.exp(x - m)
    return e / jnp.sum(e, axis=axis, keepdims=True)


# -------------------------------- kernel -------------------------------------

def _linear_attention_kernel(x_ref, wqkv_ref, wout_ref, bout_ref, g_ref, o_ref,
                             *, heads, dim_head, hw):
    # x_ref:    VMEM (1, C, HW)          -- one image, channels on sublanes, HW on lanes
    # wqkv_ref: VMEM (3*heads*dim_head, C)   to_qkv 1x1-conv weight (no bias)
    # wout_ref: VMEM (C, heads*dim_head)     to_out 1x1-conv weight
    # bout_ref: VMEM (C, 1)                  to_out 1x1-conv bias
    # g_ref:    VMEM (C, 1)                  LayerNorm gain
    # o_ref:    VMEM (1, C, HW)
    scale = dim_head ** (-0.5)
    hidden = heads * dim_head

    x = x_ref[0]                                                   # (C, HW)

    # to_qkv: 1x1 conv over channels -> (3*hidden, HW), output lane-dense (N = HW).
    qkv = jnp.dot(wqkv_ref[...], x, preferred_element_type=jnp.float32)
    q = qkv[0:hidden].reshape(heads, dim_head, hw)
    k = qkv[hidden:2 * hidden].reshape(heads, dim_head, hw)
    v = qkv[2 * hidden:3 * hidden].reshape(heads, dim_head, hw)

    q = _softmax(q, axis=1) * scale          # softmax over dim_head (sublane reduce)
    k = _softmax(k, axis=2)                  # softmax over spatial (lane reduce)
    v = v * (1.0 / hw)

    # context[h, e, d] = sum_n v[h, e, n] * k[h, d, n]   (batched MXU, K = HW)
    context = jnp.einsum('hen,hdn->hed', v, k, preferred_element_type=jnp.float32)
    # out[h, e, n] = sum_d context[h, e, d] * q[h, d, n] (batched MXU, N = HW lane-dense)
    out = jnp.einsum('hed,hdn->hen', context, q, preferred_element_type=jnp.float32)
    out = out.reshape(hidden, hw)                                  # (hidden, HW)

    # to_out: 1x1 conv + bias, then channel LayerNorm (f32 -> eps = 1e-5).
    y = jnp.dot(wout_ref[...], out, preferred_element_type=jnp.float32) + bout_ref[...]
    mean = jnp.mean(y, axis=0, keepdims=True)
    var = jnp.mean((y - mean) * (y - mean), axis=0, keepdims=True)   # unbiased=False
    o_ref[0] = (y - mean) * jax.lax.rsqrt(var + 1e-5) * g_ref[...]


# ------------------------------- wrapper --------------------------------------

def linear_attention(x_nchw, params, *, heads=4, dim_head=32):
    B, C, H, W = x_nchw.shape
    hw = H * W
    hidden = heads * dim_head

    x_r = x_nchw.reshape(B, C, hw)                         # free reshape, no transpose

    w_qkv = params["w_qkv"].astype(jnp.float32)            # (3*hidden, C)
    w_out = params["w_out"].astype(jnp.float32)            # (C, hidden)
    b_out = params["b_out"].reshape(C, 1).astype(jnp.float32)
    g = params["g"].reshape(C, 1).astype(jnp.float32)

    kernel = partial(_linear_attention_kernel,
                     heads=heads, dim_head=dim_head, hw=hw)

    out = pl.pallas_call(
        kernel,
        out_shape=jax.ShapeDtypeStruct((B, C, hw), jnp.float32),
        grid_spec=pltpu.PrefetchScalarGridSpec(
            num_scalar_prefetch=0,
            grid=(B,),
            in_specs=[
                pl.BlockSpec((1, C, hw), lambda b: (b, 0, 0)),       # x
                pl.BlockSpec((3 * hidden, C), lambda b: (0, 0)),     # to_qkv weight
                pl.BlockSpec((C, hidden), lambda b: (0, 0)),         # to_out weight
                pl.BlockSpec((C, 1), lambda b: (0, 0)),              # to_out bias
                pl.BlockSpec((C, 1), lambda b: (0, 0)),              # LayerNorm gain
            ],
            out_specs=pl.BlockSpec((1, C, hw), lambda b: (b, 0, 0)),
        ),
        compiler_params=pltpu.CompilerParams(
            dimension_semantics=("parallel",)),   # independent per-batch blocks -> v7x 2-TC split
    )(x_r, w_qkv, w_out, b_out, g)

    return out.reshape(B, C, H, W)


# --------------------------- pure-JAX reference --------------------------------

def reference_linear_attention(x, params, *, heads=4, dim_head=32):
    B, C, H, W = x.shape
    hw = H * W
    hidden = heads * dim_head
    scale = dim_head ** (-0.5)

    qkv = jnp.einsum('oc,bchw->bohw', params["w_qkv"], x)            # (B, 3*hidden, H, W)
    q, k, v = jnp.split(qkv, 3, axis=1)
    q = q.reshape(B, heads, dim_head, hw)
    k = k.reshape(B, heads, dim_head, hw)
    v = v.reshape(B, heads, dim_head, hw)

    q = _softmax(q, axis=-2) * scale
    k = _softmax(k, axis=-1)
    v = v / hw

    context = jnp.einsum('bhdn,bhen->bhde', k, v)
    out = jnp.einsum('bhde,bhdn->bhen', context, q)
    out = out.reshape(B, hidden, H, W)

    y = (jnp.einsum('oc,bchw->bohw', params["w_out"], out)
         + params["b_out"][None, :, None, None])
    mean = jnp.mean(y, axis=1, keepdims=True)
    var = jnp.mean((y - mean) ** 2, axis=1, keepdims=True)
    return (y - mean) * jax.lax.rsqrt(var + 1e-5) * params["g"][None, :, None, None]


# ----------------------------------- main --------------------------------------

if __name__ == "__main__":
    B, dim, H, W = 2, 4, 16, 16
    heads, dim_head = 4, 32
    hidden = heads * dim_head

    key = jax.random.PRNGKey(0)
    k_x, k_wq, k_wo, k_bo, k_g = jax.random.split(key, 5)

    x = jax.random.normal(k_x, (B, dim, H, W), jnp.float32)
    params = {
        "w_qkv": jax.random.normal(k_wq, (3 * hidden, dim), jnp.float32) * 0.2,
        "w_out": jax.random.normal(k_wo, (dim, hidden), jnp.float32) * 0.1,
        "b_out": jax.random.normal(k_bo, (dim,), jnp.float32) * 0.1,
        "g": 1.0 + 0.1 * jax.random.normal(k_g, (dim,), jnp.float32),
    }

    out = linear_attention(x, params, heads=heads, dim_head=dim_head)
    out = jax.block_until_ready(out)

    ref = reference_linear_attention(x, params, heads=heads, dim_head=dim_head)
    max_err = float(jnp.max(jnp.abs(out - ref)))
    assert jnp.allclose(out, ref, rtol=1e-3, atol=1e-3), max_err

    print("KERNEL_OK")
</pallas_src>

<mosaic_0001>
module attributes {stable_mosaic.version = 11 : i64} {
  func.func @_linear_attention_kernel(%arg0: i32, %arg1: memref<1x4x256xf32, #tpu.memory_space<vmem>>, %arg2: memref<384x4xf32, #tpu.memory_space<vmem>>, %arg3: memref<4x128xf32, #tpu.memory_space<vmem>>, %arg4: memref<4x1xf32, #tpu.memory_space<vmem>>, %arg5: memref<4x1xf32, #tpu.memory_space<vmem>>, %arg6: memref<1x4x256xf32, #tpu.memory_space<vmem>>) attributes {dimension_semantics = [#tpu.dimension_semantics<parallel>], iteration_bounds = array<i64: 2>, scalar_prefetch = 0 : i64, scratch_operands = 0 : i64, tpu.core_type = #tpu.core_type<tc>, window_params = [{transform_indices = @transform_0, window_bounds = array<i64: 1, 4, 256>}, {pipeline_mode = #tpu.pipeline_mode<synchronous>, transform_indices = @transform_1, window_bounds = array<i64: 384, 4>}, {pipeline_mode = #tpu.pipeline_mode<synchronous>, transform_indices = @transform_2, window_bounds = array<i64: 4, 128>}, {pipeline_mode = #tpu.pipeline_mode<synchronous>, transform_indices = @transform_3, window_bounds = array<i64: 4, 1>}, {pipeline_mode = #tpu.pipeline_mode<synchronous>, transform_indices = @transform_4, window_bounds = array<i64: 4, 1>}, {transform_indices = @transform_5, window_bounds = array<i64: 1, 4, 256>}]} {
    %c0 = arith.constant 0 : index
    %c0_0 = arith.constant 0 : index
    %c0_1 = arith.constant 0 : index
    %0 = vector.load %arg1[%c0, %c0_0, %c0_1] : memref<1x4x256xf32, #tpu.memory_space<vmem>>, vector<1x4x256xf32>
    %1 = vector.shape_cast %0 : vector<1x4x256xf32> to vector<4x256xf32>
    %c0_2 = arith.constant 0 : index
    %c0_3 = arith.constant 0 : index
    %2 = vector.load %arg2[%c0_2, %c0_3] : memref<384x4xf32, #tpu.memory_space<vmem>>, vector<384x4xf32>
    %cst = arith.constant dense<0.000000e+00> : vector<384x256xf32>
    %3 = tpu.matmul %2, %1, %cst {dimension_numbers = #tpu.dot_dimension_numbers<[1], [0], [0], [1], [0, 0, 1, 1], [], []>} : vector<384x4xf32>, vector<4x256xf32>, vector<384x256xf32> -> vector<384x256xf32>
    %4 = vector.extract_strided_slice %3 {offsets = [0, 0], sizes = [128, 256], strides = [1, 1]} : vector<384x256xf32> to vector<128x256xf32>
    %5 = vector.shape_cast %4 : vector<128x256xf32> to vector<4x32x256xf32>
    %6 = vector.extract_strided_slice %3 {offsets = [128, 0], sizes = [128, 256], strides = [1, 1]} : vector<384x256xf32> to vector<128x256xf32>
    %7 = vector.shape_cast %6 : vector<128x256xf32> to vector<4x32x256xf32>
    %8 = vector.extract_strided_slice %3 {offsets = [256, 0], sizes = [128, 256], strides = [1, 1]} : vector<384x256xf32> to vector<128x256xf32>
    %9 = vector.shape_cast %8 : vector<128x256xf32> to vector<4x32x256xf32>
    %cst_4 = arith.constant dense<0xFF800000> : vector<4x256xf32>
    %10 = vector.multi_reduction <maximumf>, %5, %cst_4 [1] : vector<4x32x256xf32> to vector<4x256xf32>
    %11 = vector.shape_cast %10 : vector<4x256xf32> to vector<4x1x256xf32>
    %12 = vector.broadcast %11 : vector<4x1x256xf32> to vector<4x32x256xf32>
    %13 = arith.subf %5, %12 : vector<4x32x256xf32>
    %14 = math.exp %13 : vector<4x32x256xf32>
    %cst_5 = arith.constant dense<0.000000e+00> : vector<4x256xf32>
    %15 = vector.multi_reduction <add>, %14, %cst_5 [1] : vector<4x32x256xf32> to vector<4x256xf32>
    %16 = vector.shape_cast %15 : vector<4x256xf32> to vector<4x1x256xf32>
    %17 = vector.broadcast %16 : vector<4x1x256xf32> to vector<4x32x256xf32>
    %18 = arith.divf %14, %17 : vector<4x32x256xf32>
    %cst_6 = arith.constant 0.176776692 : f32
    %19 = vector.broadcast %cst_6 : f32 to vector<4x32x256xf32>
    %20 = arith.mulf %18, %19 : vector<4x32x256xf32>
    %cst_7 = arith.constant dense<0xFF800000> : vector<4x32xf32>
    %21 = vector.multi_reduction <maximumf>, %7, %cst_7 [2] : vector<4x32x256xf32> to vector<4x32xf32>
    %22 = vector.shape_cast %21 : vector<4x32xf32> to vector<4x32x1xf32>
    %23 = vector.broadcast %22 : vector<4x32x1xf32> to vector<4x32x256xf32>
    %24 = arith.subf %7, %23 : vector<4x32x256xf32>
    %25 = math.exp %24 : vector<4x32x256xf32>
    %cst_8 = arith.constant dense<0.000000e+00> : vector<4x32xf32>
    %26 = vector.multi_reduction <add>, %25, %cst_8 [2] : vector<4x32x256xf32> to vector<4x32xf32>
    %27 = vector.shape_cast %26 : vector<4x32xf32> to vector<4x32x1xf32>
    %28 = vector.broadcast %27 : vector<4x32x1xf32> to vector<4x32x256xf32>
    %29 = arith.divf %25, %28 : vector<4x32x256xf32>
    %cst_9 = arith.constant 3.906250e-03 : f32
    %30 = vector.broadcast %cst_9 : f32 to vector<4x32x256xf32>
    %31 = arith.mulf %9, %30 : vector<4x32x256xf32>
    "tpu.trace_start"() <{level = 10 : i32, message = "hen,hdn->hed"}> : () -> ()
    %cst_10 = arith.constant dense<0.000000e+00> : vector<4x32x32xf32>
    %32 = tpu.matmul %31, %29, %cst_10 {dimension_numbers = #tpu.dot_dimension_numbers<[2], [2], [1], [1], [0, 0, 0, 1, 1, 1], [0], [0]>} : vector<4x32x256xf32>, vector<4x32x256xf32>, vector<4x32x32xf32> -> vector<4x32x32xf32>
    "tpu.trace_stop"() : () -> ()
    "tpu.trace_start"() <{level = 10 : i32, message = "hed,hdn->hen"}> : () -> ()
    %cst_11 = arith.constant dense<0.000000e+00> : vector<4x32x256xf32>
    %33 = tpu.matmul %32, %20, %cst_11 {dimension_numbers = #tpu.dot_dimension_numbers<[2], [1], [1], [2], [0, 0, 0, 1, 1, 2], [0], [0]>} : vector<4x32x32xf32>, vector<4x32x256xf32>, vector<4x32x256xf32> -> vector<4x32x256xf32>
    "tpu.trace_stop"() : () -> ()
    %34 = vector.shape_cast %33 : vector<4x32x256xf32> to vector<128x256xf32>
    %c0_12 = arith.constant 0 : index
    %c0_13 = arith.constant 0 : index
    %35 = vector.load %arg3[%c0_12, %c0_13] : memref<4x128xf32, #tpu.memory_space<vmem>>, vector<4x128xf32>
    %cst_14 = arith.constant dense<0.000000e+00> : vector<4x256xf32>
    %36 = tpu.matmul %35, %34, %cst_14 {dimension_numbers = #tpu.dot_dimension_numbers<[1], [0], [0], [1], [0, 0, 1, 1], [], []>} : vector<4x128xf32>, vector<128x256xf32>, vector<4x256xf32> -> vector<4x256xf32>
    %c0_15 = arith.constant 0 : index
    %c0_16 = arith.constant 0 : index
    %37 = vector.load %arg4[%c0_15, %c0_16] : memref<4x1xf32, #tpu.memory_space<vmem>>, vector<4x1xf32>
    %38 = vector.broadcast %37 : vector<4x1xf32> to vector<4x256xf32>
    %39 = arith.addf %36, %38 : vector<4x256xf32>
    %cst_17 = arith.constant dense<0.000000e+00> : vector<256xf32>
    %40 = vector.multi_reduction <add>, %39, %cst_17 [0] : vector<4x256xf32> to vector<256xf32>
    %41 = vector.shape_cast %40 : vector<256xf32> to vector<1x256xf32>
    %cst_18 = arith.constant 4.000000e+00 : f32
    %42 = vector.broadcast %cst_18 : f32 to vector<1x256xf32>
    %43 = arith.divf %41, %42 : vector<1x256xf32>
    %44 = vector.broadcast %43 : vector<1x256xf32> to vector<4x256xf32>
    %45 = arith.subf %39, %44 : vector<4x256xf32>
    %46 = vector.broadcast %43 : vector<1x256xf32> to vector<4x256xf32>
    %47 = arith.subf %39, %46 : vector<4x256xf32>
    %48 = arith.mulf %45, %47 : vector<4x256xf32>
    %cst_19 = arith.constant dense<0.000000e+00> : vector<256xf32>
    %49 = vector.multi_reduction <add>, %48, %cst_19 [0] : vector<4x256xf32> to vector<256xf32>
    %50 = vector.shape_cast %49 : vector<256xf32> to vector<1x256xf32>
    %cst_20 = arith.constant 4.000000e+00 : f32
    %51 = vector.broadcast %cst_20 : f32 to vector<1x256xf32>
    %52 = arith.divf %50, %51 : vector<1x256xf32>
    %53 = vector.broadcast %43 : vector<1x256xf32> to vector<4x256xf32>
    %54 = arith.subf %39, %53 : vector<4x256xf32>
    %cst_21 = arith.constant 9.99999974E-6 : f32
    %55 = vector.broadcast %cst_21 : f32 to vector<1x256xf32>
    %56 = arith.addf %52, %55 : vector<1x256xf32>
    %57 = math.rsqrt %56 : vector<1x256xf32>
    %58 = vector.broadcast %57 : vector<1x256xf32> to vector<4x256xf32>
    %59 = arith.mulf %54, %58 : vector<4x256xf32>
    %c0_22 = arith.constant 0 : index
    %c0_23 = arith.constant 0 : index
    %60 = vector.load %arg5[%c0_22, %c0_23] : memref<4x1xf32, #tpu.memory_space<vmem>>, vector<4x1xf32>
    %61 = vector.broadcast %60 : vector<4x1xf32> to vector<4x256xf32>
    %62 = arith.mulf %59, %61 : vector<4x256xf32>
    %c0_24 = arith.constant 0 : index
    %c0_25 = arith.constant 0 : index
    %c0_26 = arith.constant 0 : index
    %63 = vector.load %arg6[%c0_24, %c0_25, %c0_26] : memref<1x4x256xf32, #tpu.memory_space<vmem>>, vector<1x4x256xf32>
    %64 = vector.shape_cast %63 : vector<1x4x256xf32> to vector<4x256xf32>
    %65 = vector.shape_cast %62 : vector<4x256xf32> to vector<1x4x256xf32>
    tpu.vector_store %arg6[%c0_24, %c0_25, %c0_26], %65 {strides = array<i32>} : memref<1x4x256xf32, #tpu.memory_space<vmem>>, vector<1x4x256xf32>,
    return
  }
  func.func @transform_0(%arg0: i32) -> (i32, i32, i32) {
    %c0_i32 = arith.constant 0 : i32
    %c0_i32_0 = arith.constant 0 : i32
    %c0_i32_1 = arith.constant 0 : i32
    return %arg0, %c0_i32, %c0_i32_0 : i32, i32, i32
  }
  func.func @transform_1(%arg0: i32) -> (i32, i32) {
    %c0_i32 = arith.constant 0 : i32
    %c0_i32_0 = arith.constant 0 : i32
    %c0_i32_1 = arith.constant 0 : i32
    return %c0_i32, %c0_i32_0 : i32, i32
  }
  func.func @transform_2(%arg0: i32) -> (i32, i32) {
    %c0_i32 = arith.constant 0 : i32
    %c0_i32_0 = arith.constant 0 : i32
    %c0_i32_1 = arith.constant 0 : i32
    return %c0_i32, %c0_i32_0 : i32, i32
  }
  func.func @transform_3(%arg0: i32) -> (i32, i32) {
    %c0_i32 = arith.constant 0 : i32
    %c0_i32_0 = arith.constant 0 : i32
    %c0_i32_1 = arith.constant 0 : i32
    return %c0_i32, %c0_i32_0 : i32, i32
  }
  func.func @transform_4(%arg0: i32) -> (i32, i32) {
    %c0_i32 = arith.constant 0 : i32
    %c0_i32_0 = arith.constant 0 : i32
    %c0_i32_1 = arith.constant 0 : i32
    return %c0_i32, %c0_i32_0 : i32, i32
  }
  func.func @transform_5(%arg0: i32) -> (i32, i32, i32) {
    %c0_i32 = arith.constant 0 : i32
    %c0_i32_0 = arith.constant 0 : i32
    %c0_i32_1 = arith.constant 0 : i32
    return %arg0, %c0_i32, %c0_i32_0 : i32, i32, i32
  }
}

</mosaic_0001>

<bundles_post_ra>
// kernel: tpu_custom_call.1
= control target key start
LH: loop header
LB: loop body
LE: loop exit
PB: predicated region body
PF: predicated region fallthrough
CT: control target
= control target key end

     0   :  { %10 = vsyncpa [#allocation3], 0  ;;  %s3954_s0 = inlined_call_operand.vmem [shape: f32[2,4,256], index: 0, kind: input, shape index: {}]   ;;  %s3955_s1 = inlined_call_operand.vmem [shape: f32[384,4], index: 1, kind: input, shape index: {}]   ;;  %s3956_s2 = inlined_call_operand.vmem [shape: f32[4,128], index: 2, kind: input, shape index: {}]   ;;  %s3957_s3 = inlined_call_operand.vmem [shape: f32[4,1], index: 3, kind: input, shape index: {}]   ;;  %s3958_s4 = inlined_call_operand.vmem [shape: f32[4,1], index: 4, kind: input, shape index: {}]   ;;  %s3959_s5 = inlined_call_operand.hbm [shape: f32[2,4,256], index: 5, kind: output, shape index: {}]  }
   0x1   :  { %12 = vsyncpa [#allocation3 + $0x1], 0  ;;  %s2813_s18 = smov 0   ;;  %s2815_s19 = smov 0  }
   0x2   :  { %s2817_s20 = smov 0   ;;  %s2819_s21 = smov 0  }
   0x3 LB: > { %s2834_s22 = sadd.s32 4294967295, %s2778_s21   ;;  %s2314_s23 = sadd.s32 4294967294, %s2778_s21   ;;  %s2778_s21 = sphi %s2819_s21, %s4112_s21   ;;  %s2774_s20 = sphi %s2817_s20, %s4111_s20   ;;  %s2770_s19 = sphi %s2815_s19, %s4110_s19   ;;  %s2766_s18 = sphi %s2813_s18, %s4109_s18  }
   0x4   : > { %s2838_s24 = sadd.s32 1, %s2778_s21   ;;  %s135_s25 = sadd.s32 1, %s2774_s20 }
   0x5   : > { %s132_s26 = ssub.s32 %s2778_s21, %s2838_s24  ;;  %p145_p0 = scmp.ne.s32.totalorder %s2774_s20, %s2770_s19 }
   0x6   : > { %p133_p1 = scmp.eq.s32.totalorder %s132_s26, 0  ;;  %p146_p2 = scmp.eq.s32.totalorder %s2834_s22, 1 }
   0x7   : > { %p151_p3 = scmp.ne.s32.totalorder %s2770_s19, %s2766_s18  ;;  %p152_p4 = scmp.eq.s32.totalorder %s2314_s23, 1 }
   0x8   : > { %s2849_s27 = scalar_select %p133_p1, %s2774_s20, %s135_s25  }
   0x9   : > { %p2851_p5 = por %p146_p2, %p145_p0  ;;  %p2855_p6 = por %p152_p4, %p151_p3 }
   0xa   : > { %p2317_p7 = scmp.ge.s32.totalorder %s2778_s21, 1  ;;  %p190_p8 = scmp.lt.s32.totalorder %s2778_s21, 3 }
   0xc   : > { %p191_p9 = pnand %p2317_p7, %p190_p8 }
   0xe   : > { %194 = sbr.rel (%p191_p9) target bundleno = 1426 (0x592), region = 40 }
  0x15   : > { %p218_p10 = scmp.lt.s32.totalorder %s2834_s22, 1  ;;  %v3960_v0 = vmov 0.0   ;;  %vm419_vm0 = vcmask 1043456   ;;  %v224_v3 = vld [vmem:[%s3955_s1] sm:$0xff]  ;;  %vm274_vm1 = vcmask 31744   ;;  %v225_v4 = vld [vmem:[%s3955_s1 + $0x8] sm:$0xff] }
  0x16   : > { %488 = vmatprep.mubr.f32.mxu0 %v3960_v0  ;;  %746 = vmatprep.mubr.f32.mxu1 %v3960_v0  ;;  %v226_v5 = vld [vmem:[%s3955_s1 + $0x10] sm:$0xff]  ;;  %v227_v6 = vld [vmem:[%s3955_s1 + $0x18] sm:$0xff]  ;;  %v228_v7 = vld [vmem:[%s3955_s1 + $0x20] sm:$0xff]  ;;  %vm1701_vm2 = vcmask 261120   ;;  %s215_s16 = sand.u32 1, %s2770_s19   ;;  %s2393_s23 = sshll.u32 %s2834_s22, 7 }
  0x17   : > { %s219_s30 = scalar_select %p218_p10, %s2834_s22, 1  ;;  %v229_v8 = vld [vmem:[%s3955_s1 + $0x28] sm:$0xff]  ;;  %v230_v9 = vld [vmem:[%s3955_s1 + $0x30] sm:$0xff]  ;;  %v231_v10 = vld [vmem:[%s3955_s1 + $0x38] sm:$0xff] }
  0x18   : > { %v232_v11 = vld [vmem:[%s3955_s1 + $0x40] sm:$0xff]  ;;  %v233_v12 = vld [vmem:[%s3955_s1 + $0x48] sm:$0xff]  ;;  %v234_v13 = vld [vmem:[%s3955_s1 + $0x50] sm:$0xff]  ;;  %s2318_s17 = sshll.u32 %s215_s16, 3  ;;  %s3912_s7 = scalar_lea.hbm %s3959_s5, %s2393_s23 }
  0x19   : > { %s2392_s6 = sshll.u32 %s219_s30, 3  ;;  %v235_v14 = vld [vmem:[%s3955_s1 + $0x58] sm:$0xff]  ;;  %v236_v15 = vld [vmem:[%s3955_s1 + $0x60] sm:$0xff]  ;;  %v237_v16 = vld [vmem:[%s3955_s1 + $0x68] sm:$0xff]  ;;  %s217_s25 = scalar_lea.vmem [#allocation2], %s2318_s17 }
  0x1a   : > { %s222_s9 = scalar_lea.vmem %s3954_s0, %s2392_s6  ;;  %v238_v17 = vld [vmem:[%s3955_s1 + $0x70] sm:$0xff]  ;;  %v239_v18 = vld [vmem:[%s3955_s1 + $0x78] sm:$0xff]  ;;  %v240_v19 = vld [vmem:[%s3955_s1 + $0x80] sm:$0xff]  ;;  %s2255_s26 = sshll.u32 %s217_s25, 4  ;;  %s3914_s26 = int_to_ptr.vmem [resolvable:$true] %s2255_s26 }
  0x1b   : > { %v223_v1 = vld [vmem:[%s222_s9] sm:$0xff]  ;;  %v241_v20 = vld [vmem:[%s3955_s1 + $0x88] sm:$0xff]  ;;  %v242_v21 = vld [vmem:[%s3955_s1 + $0x90] sm:$0xff]  ;;  %s2241_s8 = scalar_lea.sflag [#allocation3], %s215_s16  ;;  %s2716_s9 = scalar_lea.vmem %s3914_s26, 128 }
  0x1c   : > { %v273_v2 = vcombine.high %v223_v1, %v223_v1  ;;  %v243_v22 = vld [vmem:[%s3955_s1 + $0x98] sm:$0xff]  ;;  %v244_v23 = vld [vmem:[%s3955_s1 + $0xa0] sm:$0xff]  ;;  %v245_v24 = vld [vmem:[%s3955_s1 + $0xa8] sm:$0xff]  ;;  %p2717_p11 = scmp.ne.s32.totalorder %s3914_s26, %s2716_s9  ;;  %s2782_s22 = smov [#allocation2]  }
  0x1d   : > { %v246_v25 = vld [vmem:[%s3955_s1 + $0xb0] sm:$0xff]  ;;  %v247_v26 = vld [vmem:[%s3955_s1 + $0xb8] sm:$0xff]  ;;  %v248_v27 = vld [vmem:[%s3955_s1 + $0xc0] sm:$0xff]  ;;  %s2720_s10 = sshll.u32 %s2782_s22, 4  ;;  %s2721_s10 = int_to_ptr.vmem [resolvable:$false] %s2720_s10 }
  0x1e   : > { %2321 = vmatprep.subr.msk.mxu0 %vm419_vm0, %v273_v2  ;;  %2490 = vmatprep.subr.msk.mxu1 %vm419_vm0, %v273_v2  ;;  %v249_v28 = vld [vmem:[%s3955_s1 + $0xc8] sm:$0xff]  ;;  %v250_v29 = vld [vmem:[%s3955_s1 + $0xd0] sm:$0xff]  ;;  %v251_v30 = vld [vmem:[%s3955_s1 + $0xd8] sm:$0xff]  ;;  %p2718_p12 = pnand %p2717_p11, %p2851_p5  ;;  %s2722_s11 = scalar_lea.vmem %s2721_s10, 256 }
  0x1f   : > { %2322 = vmatpush1.msk.msra.mxu0 %vm419_vm0, %v223_v1  ;;  %2491 = vmatpush1.msk.msra.mxu1 %vm419_vm0, %v223_v1  ;;  %v252_v31 = vld [vmem:[%s3955_s1 + $0xe0] sm:$0xff]  ;;  %v253_v32 = vld [vmem:[%s3955_s1 + $0xe8] sm:$0xff]  ;;  %v254_v33 = vld [vmem:[%s3955_s1 + $0xf0] sm:$0xff]  ;;  %p2723_p0 = scmp.lt.s32.totalorder %s3914_s26, %s2721_s10  ;;  %p2724_p1 = scmp.lt.s32.totalorder %s2722_s11, %s2716_s9 }
  0x20   : > { %2323 = vmatmul.mubr.msk.f32.vlgmr.msra.gmra.mrb[0].mxu0 %vm274_vm1, %v224_v3  ;;  %v255_v34 = vld [vmem:[%s3955_s1 + $0xf8] sm:$0xff]  ;;  %v256_v36 = vld [vmem:[%s3955_s1 + $0x100] sm:$0xff]  ;;  %v257_v38 = vld [vmem:[%s3955_s1 + $0x108] sm:$0xff]  ;;  %p2719_p13 = pneg %p2718_p12 }
  0x21   : > { %494 = vmatprep.mubr.f32.mxu0 %v3960_v0  ;;  %v258_v43 = vld [vmem:[%s3955_s1 + $0x110] sm:$0xff]  ;;  %v259_v48 = vld [vmem:[%s3955_s1 + $0x118] sm:$0xff]  ;;  %v260_v53 = vld [vmem:[%s3955_s1 + $0x120] sm:$0xff]  ;;  %p2725_p2 = por %p2724_p1, %p2723_p0 }
  0x22   : > { %v261_v60 = vld [vmem:[%s3955_s1 + $0x128] sm:$0xff] }
  0x23   : > { %p2726_p3 = pnand %p2725_p2, %p2719_p13 }
  0x24   : > { %2324 = vmatmul.mubr.msk.f32.gmra.mrb[2].mxu0 %vm274_vm1, %v225_v4 }
  0x25   : > { %500 = vmatprep.mubr.f32.mxu0 %v3960_v0 }
  0x28   : > { %2325 = vmatmul.mubr.msk.f32.gmra.mrb[4].mxu0 %vm274_vm1, %v226_v5 }
  0x29   : > { %506 = vmatprep.mubr.f32.mxu0 %v3960_v0 }
  0x2c   : > { %2326 = vmatmul.mubr.msk.f32.gmra.mrb[6].mxu0 %vm274_vm1, %v227_v6 }
  0x2d   : > { %512 = vmatprep.mubr.f32.mxu0 %v3960_v0 }
  0x30   : > { %2327 = vmatmul.mubr.msk.f32.gmra.mrb[8].mxu0 %vm274_vm1, %v228_v7 }
  0x31   : > { %518 = vmatprep.mubr.f32.mxu0 %v3960_v0 }
  0x34   : > { %2328 = vmatmul.mubr.msk.f32.gmra.mrb[10].mxu0 %vm274_vm1, %v229_v8 }
  0x35   : > { %524 = vmatprep.mubr.f32.mxu0 %v3960_v0 }
  0x38   : > { %2329 = vmatmul.mubr.msk.f32.gmra.mrb[12].mxu0 %vm274_vm1, %v230_v9 }
  0x39   : > { %530 = vmatprep.mubr.f32.mxu0 %v3960_v0 }
  0x3c   : > { %2330 = vmatmul.mubr.msk.f32.gmra.mrb[14].mxu0 %vm274_vm1, %v231_v10 }
  0x3d   : > { %536 = vmatprep.mubr.f32.mxu0 %v3960_v0 }
  0x40   : > { %2331 = vmatmul.mubr.msk.f32.gmra.mrb[16].mxu0 %vm274_vm1, %v232_v11 }
  0x41   : > { %542 = vmatprep.mubr.f32.mxu0 %v3960_v0 }
  0x44   : > { %2332 = vmatmul.mubr.msk.f32.gmra.mrb[18].mxu0 %vm274_vm1, %v233_v12 }
  0x45   : > { %548 = vmatprep.mubr.f32.mxu0 %v3960_v0 }
  0x48   : > { %2333 = vmatmul.mubr.msk.f32.gmra.mrb[20].mxu0 %vm274_vm1, %v234_v13 }
  0x49   : > { %554 = vmatprep.mubr.f32.mxu0 %v3960_v0 }
  0x4c   : > { %2334 = vmatmul.mubr.msk.f32.gmra.mrb[22].mxu0 %vm274_vm1, %v235_v14 }
  0x4d   : > { %560 = vmatprep.mubr.f32.mxu0 %v3960_v0 }
  0x50   : > { %2335 = vmatmul.mubr.msk.f32.gmra.mrb[24].mxu0 %vm274_vm1, %v236_v15 }
  0x51   : > { %566 = vmatprep.mubr.f32.mxu0 %v3960_v0 }
  0x54   : > { %2336 = vmatmul.mubr.msk.f32.gmra.mrb[26].mxu0 %vm274_vm1, %v237_v16 }
  0x55   : > { %572 = vmatprep.mubr.f32.mxu0 %v3960_v0 }
  0x58   : > { %2337 = vmatmul.mubr.msk.f32.gmra.mrb[28].mxu0 %vm274_vm1, %v238_v17 }
  0x59   : > { %578 = vmatprep.mubr.f32.mxu0 %v3960_v0 }
  0x5c   : > { %2338 = vmatmul.mubr.msk.f32.gmra.mrb[30].mxu0 %vm274_vm1, %v239_v18 }
  0x5d   : > { %584 = vmatprep.mubr.f32.mxu0 %v3960_v0 }
  0x60   : > { %2339 = vmatmul.mubr.msk.f32.gmra.mrb[32].mxu0 %vm274_vm1, %v240_v19 }
  0x61   : > { %590 = vmatprep.mubr.f32.mxu0 %v3960_v0 }
  0x64   : > { %2340 = vmatmul.mubr.msk.f32.gmra.mrb[34].mxu0 %vm274_vm1, %v241_v20 }
  0x65   : > { %596 = vmatprep.mubr.f32.mxu0 %v3960_v0 }
  0x68   : > { %2341 = vmatmul.mubr.msk.f32.gmra.mrb[36].mxu0 %vm274_vm1, %v242_v21 }
  0x69   : > { %602 = vmatprep.mubr.f32.mxu0 %v3960_v0 }
  0x6c   : > { %2342 = vmatmul.mubr.msk.f32.gmra.mrb[38].mxu0 %vm274_vm1, %v243_v22 }
  0x6d   : > { %608 = vmatprep.mubr.f32.mxu0 %v3960_v0 }
  0x70   : > { %2343 = vmatmul.mubr.msk.f32.gmra.mrb[40].mxu0 %vm274_vm1, %v244_v23 }
  0x71   : > { %614 = vmatprep.mubr.f32.mxu0 %v3960_v0 }
  0x74   : > { %2344 = vmatmul.mubr.msk.f32.gmra.mrb[42].mxu0 %vm274_vm1, %v245_v24 }
  0x75   : > { %620 = vmatprep.mubr.f32.mxu0 %v3960_v0 }
  0x78   : > { %2345 = vmatmul.mubr.msk.f32.gmra.mrb[44].mxu0 %vm274_vm1, %v246_v25 }
  0x79   : > { %626 = vmatprep.mubr.f32.mxu0 %v3960_v0 }
  0x7c   : > { %2346 = vmatmul.mubr.msk.f32.gmra.mrb[46].mxu0 %vm274_vm1, %v247_v26 }
  0x7d   : > { %632 = vmatprep.mubr.f32.mxu0 %v3960_v0 }
  0x80   : > { %2347 = vmatmul.mubr.msk.f32.gmra.mrb[48].mxu0 %vm274_vm1, %v248_v27 }
  0x81   : > { %638 = vmatprep.mubr.f32.mxu0 %v3960_v0 }
  0x84   : > { %2348 = vmatmul.mubr.msk.f32.gmra.mrb[50].mxu0 %vm274_vm1, %v249_v28 }
  0x85   : > { %644 = vmatprep.mubr.f32.mxu0 %v3960_v0 }
  0x88   : > { %2349 = vmatmul.mubr.msk.f32.gmra.mrb[52].mxu0 %vm274_vm1, %v250_v29 }
  0x89   : > { %650 = vmatprep.mubr.f32.mxu0 %v3960_v0 }
  0x8c   : > { %2350 = vmatmul.mubr.msk.f32.gmra.mrb[54].mxu0 %vm274_vm1, %v251_v30 }
  0x8d   : > { %656 = vmatprep.mubr.f32.mxu0 %v3960_v0 }
  0x90   : > { %2351 = vmatmul.mubr.msk.f32.gmra.mrb[56].mxu0 %vm274_vm1, %v252_v31 }
  0x91   : > { %662 = vmatprep.mubr.f32.mxu0 %v3960_v0 }
  0x94   : > { %2352 = vmatmul.mubr.msk.f32.gmra.mrb[58].mxu0 %vm274_vm1, %v253_v32 }
  0x95   : > { %668 = vmatprep.mubr.f32.mxu0 %v3960_v0 }
  0x98   : > { %2353 = vmatmul.mubr.msk.f32.gmra.mrb[60].mxu0 %vm274_vm1, %v254_v33 }
  0x99   : > { %674 = vmatprep.mubr.f32.mxu0 %v3960_v0 }
  0x9c   : > { %2354 = vmatmul.mubr.msk.f32.gmra.mrb[62].mxu0 %vm274_vm1, %v255_v34 }
  0x9d   : > { %680 = vmatprep.mubr.f32.mxu0 %v3960_v0 }
  0xa0   : > { %2355 = vmatmul.mubr.msk.f32.gmra.mrb[64].mxu0 %vm274_vm1, %v256_v36 }
  0xa1   : > { %686 = vmatprep.mubr.f32.mxu0 %v3960_v0 }
  0xa4   : > { %2356 = vmatmul.mubr.msk.f32.gmra.mrb[66].mxu0 %vm274_vm1, %v257_v38 }
  0xa5   : > { %692 = vmatprep.mubr.f32.mxu0 %v3960_v0 }
  0xa8   : > { %2357 = vmatmul.mubr.msk.f32.gmra.mrb[68].mxu0 %vm274_vm1, %v258_v43 }
  0xa9   : > { %698 = vmatprep.mubr.f32.mxu0 %v3960_v0 }
  0xac   : > { %2358 = vmatmul.mubr.msk.f32.gmra.mrb[70].mxu0 %vm274_vm1, %v259_v48 }
  0xad   : > { %704 = vmatprep.mubr.f32.mxu0 %v3960_v0 }
  0xb0   : > { %2359 = vmatmul.mubr.msk.f32.gmra.mrb[72].mxu0 %vm274_vm1, %v260_v53 }
  0xb1   : > { %710 = vmatprep.mubr.f32.mxu0 %v3960_v0 }
  0xb4   : > { %2360 = vmatmul.mubr.msk.f32.gmra.mrb[74].mxu0 %vm274_vm1, %v261_v60 }
  0xb5   : > { %716 = vmatprep.mubr.f32.mxu0 %v3960_v0 }
  0xf3   : > { %v3032_v35 = vpop.f32.mrb[0].mxu0 }
  0xf4   : > { %v3037_v37 = vpop.f32.mrb[1].mxu0 }
  0xf7   : > { %v496_v39 = vpop.f32.mrb[2].mxu0 }
  0xf8   : > { %v777_v40 = vmax.f32 %v3032_v35, %v496_v39  ;;  %v3045_v41 = vpop.f32.mrb[3].mxu0 }
  0xf9   : > { %v786_v42 = vmax.f32 %v3037_v37, %v3045_v41 }
  0xfb   : > { %v502_v44 = vpop.f32.mrb[4].mxu0 }
  0xfc   : > { %v778_v45 = vmax.f32 %v777_v40, %v502_v44  ;;  %v3054_v46 = vpop.f32.mrb[5].mxu0 }
  0xfd   : > { %v787_v47 = vmax.f32 %v786_v42, %v3054_v46 }
  0xff   : > { %v508_v49 = vpop.f32.mrb[6].mxu0 }
 0x100   : > { %v779_v50 = vmax.f32 %v778_v45, %v508_v49  ;;  %v3062_v51 = vpop.f32.mrb[7].mxu0 }
 0x101   : > { %v788_v52 = vmax.f32 %v787_v47, %v3062_v51 }
 0x102   : > { %v780_v54 = vrot.slane %v779_v50, 4 }
 0x103   : > { %v789_v55 = vrot.slane %v788_v52, 4  ;;  %v3070_v56 = vpop.f32.mrb[8].mxu0 }
 0x104   : > { %v781_v57 = vmax.f32 %v779_v50, %v780_v54  ;;  %v3072_v58 = vpop.f32.mrb[9].mxu0 }
 0x105   : > { %v790_v59 = vmax.f32 %v788_v52, %v789_v55 }
 0x106   : > { %v782_v61 = vrot.slane %v781_v57, 2 }
 0x107   : > { %v791_v62 = vrot.slane %v790_v59, 2  ;;  %v3079_v63 = vpop.f32.mrb[10].mxu0 }
 0x108   : > { %v783_v1 = vmax.f32 %v781_v57, %v782_v61  ;;  %v795_v2 = vmax.f32 %v3070_v56, %v3079_v63  ;;  %v3083_v3 = vpop.f32.mrb[11].mxu0 }
 0x109   : > { %v792_v4 = vmax.f32 %v790_v59, %v791_v62  ;;  %v804_v5 = vmax.f32 %v3072_v58, %v3083_v3 }
 0x10a   : > { %v784_v6 = vrot.slane %v783_v1, 1 }
 0x10b   : > { %v793_v7 = vrot.slane %v792_v4, 1  ;;  %v3089_v8 = vpop.f32.mrb[12].mxu0 }
 0x10c   : > { %v785_v9 = vmax.f32 %v783_v1, %v784_v6  ;;  %v796_v10 = vmax.f32 %v795_v2, %v3089_v8  ;;  %v3092_v11 = vpop.f32.mrb[13].mxu0 }
 0x10d   : > { %v794_v12 = vmax.f32 %v792_v4, %v793_v7  ;;  %v805_v13 = vmax.f32 %v804_v5, %v3092_v11 }
 0x10e   : > { %v849_v14 = vsub.f32 %v3032_v35, %v785_v9  ;;  %v851_v15 = vsub.f32 %v496_v39, %v785_v9  ;;  %v853_v16 = vsub.f32 %v502_v44, %v785_v9  ;;  %v855_v17 = vsub.f32 %v508_v49, %v785_v9 }
 0x10f   : > { %v850_v18 = vsub.f32 %v3037_v37, %v794_v12  ;;  %v852_v19 = vsub.f32 %v3045_v41, %v794_v12  ;;  %v854_v20 = vsub.f32 %v3054_v46, %v794_v12  ;;  %v856_v21 = vsub.f32 %v3062_v51, %v794_v12  ;;  %v532_v22 = vpop.f32.mrb[14].mxu0 }
 0x110   : > { %v881_v23 = vmul.f32 1.442695, %v849_v14  ;;  %v885_v24 = vmul.f32 1.442695, %v851_v15  ;;  %v889_v25 = vmul.f32 1.442695, %v853_v16  ;;  %v797_v26 = vmax.f32 %v796_v10, %v532_v22 }
 0x111   : > { %v893_v27 = vmul.f32 1.442695, %v855_v17  ;;  %v883_v28 = vmul.f32 1.442695, %v850_v18  ;;  %v3100_v30 = vpop.f32.mrb[15].mxu0 }
 0x112   : > { %2536 = vpow2.f32 %v881_v23  ;;  %v798_v29 = vrot.slane %v797_v26, 4  ;;  %v887_v31 = vmul.f32 1.442695, %v852_v19  ;;  %v806_v32 = vmax.f32 %v805_v13, %v3100_v30 }
 0x113   : > { %2538 = vpow2.f32 %v885_v24  ;;  %v3103_v33 = vpop.f32.mrb[16].mxu0  ;;  %v891_v36 = vmul.f32 1.442695, %v854_v20  ;;  %v895_v39 = vmul.f32 1.442695, %v856_v21 }
 0x114   : > { %2540 = vpow2.f32 %v889_v25  ;;  %v799_v34 = vmax.f32 %v797_v26, %v798_v29  ;;  %v3105_v35 = vpop.f32.mrb[17].mxu0  ;;  %v807_v37 = vrot.slane %v806_v32, 4 }
 0x115   : > { %2542 = vpow2.f32 %v893_v27 }
 0x116   : > { %2544 = vpow2.f32 %v883_v28  ;;  %v800_v38 = vrot.slane %v799_v34, 2  ;;  %v808_v40 = vmax.f32 %v806_v32, %v807_v37 }
 0x117   : > { %2546 = vpow2.f32 %v887_v31  ;;  %v3107_v41 = vpop.f32.mrb[18].mxu0 }
 0x118   : > { %v801_v42 = vmax.f32 %v799_v34, %v800_v38  ;;  %v813_v43 = vmax.f32 %v3103_v33, %v3107_v41  ;;  %v3111_v44 = vpop.f32.mrb[19].mxu0  ;;  %2548 = vpow2.f32 %v891_v36  ;;  %v809_v45 = vrot.slane %v808_v40, 2 }
 0x119   : > { %v822_v46 = vmax.f32 %v3105_v35, %v3111_v44  ;;  %2550 = vpow2.f32 %v895_v39 }
 0x11a   : > { %v802_v47 = vrot.slane %v801_v42, 1  ;;  %v810_v48 = vmax.f32 %v808_v40, %v809_v45 }
 0x11b   : > { %v3115_v49 = vpop.f32.mrb[20].mxu0 }
 0x11c   : > { %v3117_v50 = vpop.eup %2536  ;;  %v803_v51 = vmax.f32 %v801_v42, %v802_v47  ;;  %v814_v52 = vmax.f32 %v813_v43, %v3115_v49  ;;  %v3120_v53 = vpop.f32.mrb[21].mxu0  ;;  %v811_v55 = vrot.slane %v810_v48, 1 }
 0x11d   : > { %v3122_v54 = vpop.eup %2538  ;;  %v823_v57 = vmax.f32 %v822_v46, %v3120_v53 }
 0x11e   : > { %v3125_v59 = vpop.eup %2540  ;;  %v945_v60 = vadd.f32 %v3122_v54, %v3117_v50  ;;  %v857_v61 = vsub.f32 %v3070_v56, %v803_v51  ;;  %v859_v62 = vsub.f32 %v3079_v63, %v803_v51  ;;  %v861_v1 = vsub.f32 %v3089_v8, %v803_v51 }
 0x11f   : > { %v3132_v2 = vpop.eup %2542  ;;  %v863_v4 = vsub.f32 %v532_v22, %v803_v51  ;;  %v812_v5 = vmax.f32 %v810_v48, %v811_v55  ;;  %v3134_v6 = vpop.f32.mrb[22].mxu0 }
 0x120   : > { %v3136_v7 = vpop.eup %2544  ;;  %v946_v9 = vadd.f32 %v3125_v59, %v945_v60  ;;  %v897_v10 = vmul.f32 1.442695, %v857_v61  ;;  %v901_v12 = vmul.f32 1.442695, %v859_v62  ;;  %v905_v13 = vmul.f32 1.442695, %v861_v1 }
 0x121   : > { %v3139_v14 = vpop.eup %2546  ;;  %v909_v56 = vmul.f32 1.442695, %v863_v4  ;;  %v858_v63 = vsub.f32 %v3072_v58, %v812_v5  ;;  %v860_v8 = vsub.f32 %v3083_v3, %v812_v5  ;;  %v862_v15 = vsub.f32 %v3092_v11, %v812_v5  ;;  %v3144_v16 = vpop.f32.mrb[23].mxu0 }
 0x122   : > { %v947_v17 = vadd.f32 %v3132_v2, %v946_v9  ;;  %v954_v18 = vadd.f32 %v3139_v14, %v3136_v7  ;;  %2552 = vpow2.f32 %v897_v10  ;;  %v864_v19 = vsub.f32 %v3100_v30, %v812_v5  ;;  %v3150_v20 = vpop.eup %2548 }
 0x123   : > { %2554 = vpow2.f32 %v901_v12  ;;  %v899_v21 = vmul.f32 1.442695, %v858_v63  ;;  %v903_v22 = vmul.f32 1.442695, %v860_v8  ;;  %v3153_v11 = vpop.f32.mrb[24].mxu0  ;;  %v3155_v23 = vpop.eup %2550  ;;  %v815_v25 = vmax.f32 %v814_v52, %v3134_v6 }
 0x124   : > { %v948_v58 = vrot.slane %v947_v17, 4  ;;  %v955_v3 = vadd.f32 %v3150_v20, %v954_v18  ;;  %2556 = vpow2.f32 %v905_v13  ;;  %v907_v24 = vmul.f32 1.442695, %v862_v15  ;;  %v3159_v27 = vpop.f32.mrb[25].mxu0 }
 0x125   : > { %2558 = vpow2.f32 %v909_v56  ;;  %v824_v26 = vmax.f32 %v823_v57, %v3144_v16  ;;  %v911_v30 = vmul.f32 1.442695, %v864_v19  ;;  %v816_v31 = vrot.slane %v815_v25, 4 }
 0x126   : > { %v949_v28 = vadd.f32 %v948_v58, %v947_v17  ;;  %v956_v29 = vadd.f32 %v3155_v23, %v955_v3  ;;  %2560 = vpow2.f32 %v899_v21 }
 0x127   : > { %2562 = vpow2.f32 %v903_v22  ;;  %v825_v32 = vrot.slane %v824_v26, 4  ;;  %v3162_v34 = vpop.f32.mrb[26].mxu0  ;;  %v817_v40 = vmax.f32 %v815_v25, %v816_v31 }
 0x128   : > { %v950_v36 = vrot.slane %v949_v28, 2  ;;  %v957_v37 = vrot.slane %v956_v29, 4  ;;  %v831_v38 = vmax.f32 %v3153_v11, %v3162_v34  ;;  %v3166_v39 = vpop.f32.mrb[27].mxu0  ;;  %2564 = vpow2.f32 %v907_v24 }
 0x129   : > { %v826_v42 = vmax.f32 %v824_v26, %v825_v32  ;;  %v840_v43 = vmax.f32 %v3159_v27, %v3166_v39  ;;  %2566 = vpow2.f32 %v911_v30  ;;  %v818_v47 = vrot.slane %v817_v40, 2 }
 0x12a   : > { %v951_v45 = vadd.f32 %v950_v36, %v949_v28  ;;  %v958_v46 = vadd.f32 %v957_v37, %v956_v29 }
 0x12b   : > { %v827_v48 = vrot.slane %v826_v42, 2  ;;  %v3170_v51 = vpop.f32.mrb[28].mxu0  ;;  %v819_v1 = vmax.f32 %v817_v40, %v818_v47 }
 0x12c   : > { %v3172_v52 = vpop.eup %2552  ;;  %v952_v55 = vrot.slane %v951_v45, 1  ;;  %v959_v57 = vrot.slane %v958_v46, 2  ;;  %v832_v60 = vmax.f32 %v831_v38, %v3170_v51  ;;  %v3175_v61 = vpop.f32.mrb[29].mxu0 }
 0x12d   : > { %v3177_v62 = vpop.eup %2554  ;;  %v828_v4 = vmax.f32 %v826_v42, %v827_v48  ;;  %v841_v5 = vmax.f32 %v840_v43, %v3175_v61  ;;  %v820_v63 = vrot.slane %v819_v1, 1 }
 0x12e   : > { %v3180_v9 = vpop.eup %2556  ;;  %v953_v10 = vadd.f32 %v952_v55, %v951_v45  ;;  %v960_v12 = vadd.f32 %v959_v57, %v958_v46  ;;  %v963_v13 = vadd.f32 %v3177_v62, %v3172_v52 }
 0x12f   : > { %v3184_v56 = vpop.eup %2558  ;;  %v829_v8 = vrot.slane %v828_v4, 1  ;;  %v3186_v15 = vpop.f32.mrb[30].mxu0  ;;  %v821_v3 = vmax.f32 %v819_v1, %v820_v63 }
 0x130   : > { %v3188_v17 = vpop.eup %2560  ;;  %2568 = vrcp.f32 %v953_v10  ;;  %v961_v18 = vrot.slane %v960_v12, 1  ;;  %v964_v19 = vadd.f32 %v3180_v9, %v963_v13  ;;  %v833_v21 = vmax.f32 %v832_v60, %v3186_v15  ;;  %v3192_v22 = vpop.f32.mrb[31].mxu0 }
 0x131   : > { %v3194_v58 = vpop.eup %2562  ;;  %v830_v24 = vmax.f32 %v828_v4, %v829_v8  ;;  %v842_v25 = vmax.f32 %v841_v5, %v3192_v22  ;;  %v865_v32 = vsub.f32 %v3103_v33, %v821_v3  ;;  %v867_v36 = vsub.f32 %v3107_v41, %v821_v3 }
 0x132   : > { %v962_v26 = vadd.f32 %v961_v18, %v960_v12  ;;  %v965_v28 = vadd.f32 %v3184_v56, %v964_v19  ;;  %v972_v29 = vadd.f32 %v3194_v58, %v3188_v17  ;;  %v834_v30 = vrot.slane %v833_v21, 4  ;;  %v3200_v31 = vpop.eup %2564 }
 0x133   : > { %v869_v37 = vsub.f32 %v3115_v49, %v821_v3  ;;  %v871_v38 = vsub.f32 %v3134_v6, %v821_v3  ;;  %v3206_v40 = vpop.f32.mrb[32].mxu0  ;;  %v866_v45 = vsub.f32 %v3105_v35, %v830_v24  ;;  %v3212_v47 = vpop.eup %2566  ;;  %v913_v48 = vmul.f32 1.442695, %v865_v32 }
 0x134   : > { %2570 = vrcp.f32 %v962_v26  ;;  %v966_v42 = vrot.slane %v965_v28, 4  ;;  %v973_v43 = vadd.f32 %v3200_v31, %v972_v29  ;;  %v3210_v46 = vpop.f32.mrb[33].mxu0  ;;  %v917_v33 = vmul.f32 1.442695, %v867_v36 }
 0x135   : > { %v921_v55 = vmul.f32 1.442695, %v869_v37  ;;  %v868_v41 = vsub.f32 %v3111_v44, %v830_v24  ;;  %v925_v57 = vmul.f32 1.442695, %v871_v38  ;;  %v870_v60 = vsub.f32 %v3120_v53, %v830_v24 }
 0x136   : > { %v967_v49 = vadd.f32 %v966_v42, %v965_v28  ;;  %v974_v6 = vadd.f32 %v3212_v47, %v973_v43  ;;  %2572 = vpow2.f32 %v913_v48  ;;  %v872_v1 = vsub.f32 %v3144_v16, %v830_v24 }
 0x137   : > { %v915_v4 = vmul.f32 1.442695, %v866_v45  ;;  %v919_v35 = vmul.f32 1.442695, %v868_v41  ;;  %v3218_v5 = vpop.f32.mrb[34].mxu0  ;;  %2574 = vpow2.f32 %v917_v33  ;;  %v835_v8 = vmax.f32 %v833_v21, %v834_v30 }
 0x138   : > { %v968_v10 = vrot.slane %v967_v49, 2  ;;  %v975_v12 = vrot.slane %v974_v6, 4  ;;  %v923_v13 = vmul.f32 1.442695, %v870_v60  ;;  %v3220_v63 = vpop.f32.mrb[35].mxu0  ;;  %2576 = vpow2.f32 %v921_v55 }
 0x139   : > { %v927_v44 = vmul.f32 1.442695, %v872_v1  ;;  %v843_v18 = vrot.slane %v842_v25, 4  ;;  %2578 = vpow2.f32 %v925_v57  ;;  %v1089_v16 = vmax.f32 %v3206_v40, %v3210_v46 }
 0x13a   : > { %v3222_v19 = vpop.eup %2568  ;;  %v969_v53 = vadd.f32 %v968_v10, %v967_v49  ;;  %v976_v3 = vadd.f32 %v975_v12, %v974_v6  ;;  %2580 = vpow2.f32 %v915_v4  ;;  %v836_v24 = vrot.slane %v835_v8, 2 }
 0x13b   : > { %v844_v26 = vmax.f32 %v842_v25, %v843_v18  ;;  %v1092_v28 = vmax.f32 %v3218_v5, %v3220_v63  ;;  %v3228_v29 = vpop.f32.mrb[36].mxu0  ;;  %2582 = vpow2.f32 %v919_v35  ;;  %1090 = vmax.xlane.f32.xlu0 %v1089_v16  ;;  %v1018_v30 = vmul.f32 %v3222_v19, %v3117_v50 }
 0x13c   : > { %v970_v32 = vrot.slane %v969_v53, 1  ;;  %v977_v36 = vrot.slane %v976_v3, 2  ;;  %v3230_v21 = vpop.f32.mrb[37].mxu0  ;;  %2584 = vpow2.f32 %v923_v13  ;;  %v837_v37 = vmax.f32 %v835_v8, %v836_v24 }
 0x13d   : > { %v845_v38 = vrot.slane %v844_v26, 2  ;;  %v1095_v25 = vmax.f32 %v3228_v29, %v3230_v21  ;;  %2586 = vpow2.f32 %v927_v44  ;;  %v1021_v48 = vmul.f32 %v3222_v19, %v3122_v54 }
 0x13e   : > { %v3236_v42 = vpop.eup %2570  ;;  %v971_v43 = vadd.f32 %v970_v32, %v969_v53  ;;  %v978_v45 = vadd.f32 %v977_v36, %v976_v3  ;;  %v838_v33 = vrot.slane %v837_v37, 1  ;;  %v3248_v60 = vmul.f32 0.17677669, %v1018_v30 }
 0x13f   : > { %v846_v55 = vmax.f32 %v844_v26, %v845_v38  ;;  %1096 = vmax.xlane.f32.xlu1 %v1095_v25  ;;  %v3240_v41 = vpop.f32.mrb[38].mxu0  ;;  %v1020_v50 = vmul.f32 %v3236_v42, %v3136_v7  ;;  %v1022_v49 = vmul.f32 %v3236_v42, %v3139_v14  ;;  %1093 = vmax.xlane.f32.xlu0 %v1092_v28  ;;  %v3250_v1 = vmul.f32 0.17677669, %v1021_v48 }
 0x140   : > { %2588 = vrcp.f32 %v971_v43  ;;  %v979_v6 = vrot.slane %v978_v45, 1  ;;  %v3246_v57 = vpop.f32.mrb[39].mxu0  ;;  %3999 = vst [vmem:[#allocation5_spill] sm:$0xff] %v3248_v60  ;;  %v3252_v54 = vpop.eup %2572  ;;  %v839_v4 = vmax.f32 %v837_v37, %v838_v33  ;;  %v1024_v8 = vmul.f32 %v3236_v42, %v3150_v20 }
 0x141   : > { %4000 = vst [vmem:[#allocation6_spill] sm:$0xff] %v3250_v1  ;;  %v847_v35 = vrot.slane %v846_v55, 1  ;;  %v1098_v10 = vmax.f32 %v3240_v41, %v3246_v57  ;;  %v3256_v7 = vmul.f32 0.17677669, %v1020_v50  ;;  %v3258_v12 = vpop.eup %2574  ;;  %v3260_v13 = vmul.f32 0.17677669, %v1022_v49 }
 0x142   : > { %v980_v14 = vadd.f32 %v979_v6, %v978_v45  ;;  %v3266_v18 = vpop.eup %2576  ;;  %v981_v53 = vadd.f32 %v3258_v12, %v3252_v54  ;;  %v873_v3 = vsub.f32 %v3153_v11, %v839_v4  ;;  %v875_v16 = vsub.f32 %v3162_v34, %v839_v4 }
 0x143   : > { %4001 = vst [vmem:[#allocation7_spill] sm:$0xff] %v3256_v7  ;;  %4002 = vst [vmem:[#allocation8_spill] sm:$0xff] %v3260_v13  ;;  %v877_v24 = vsub.f32 %v3170_v51, %v839_v4  ;;  %1099 = vmax.xlane.f32.xlu1 %v1098_v10  ;;  %v3273_v26 = vpop.f32.mrb[40].mxu0  ;;  %v3275_v28 = vpop.eup %2578  ;;  %v879_v32 = vsub.f32 %v3186_v15, %v839_v4  ;;  %v848_v20 = vmax.f32 %v846_v55, %v847_v35 }
 0x144   : > { %2590 = vrcp.f32 %v980_v14  ;;  %v3278_v36 = vpop.f32.mrb[41].mxu0  ;;  %v3282_v37 = vpop.eup %2580  ;;  %v982_v11 = vadd.f32 %v3266_v18, %v981_v53  ;;  %v929_v34 = vmul.f32 1.442695, %v873_v3  ;;  %v933_v51 = vmul.f32 1.442695, %v875_v16 }
 0x145   : > { %v937_v38 = vmul.f32 1.442695, %v877_v24  ;;  %v3285_v25 = vpop.eup %2582  ;;  %v941_v43 = vmul.f32 1.442695, %v879_v32  ;;  %v874_v45 = vsub.f32 %v3159_v27, %v848_v20  ;;  %v876_v15 = vsub.f32 %v3166_v39, %v848_v20 }
 0x146   : > { %v878_v48 = vsub.f32 %v3175_v61, %v848_v20  ;;  %v3290_v33 = vpop.eup %2584  ;;  %v983_v55 = vadd.f32 %v3275_v28, %v982_v11  ;;  %v990_v50 = vadd.f32 %v3285_v25, %v3282_v37  ;;  %2592 = vpow2.f32 %v929_v34 }
 0x147   : > { %v880_v49 = vsub.f32 %v3192_v22, %v848_v20  ;;  %v3296_v6 = vpop.f32.mrb[42].mxu0  ;;  %v3298_v4 = vpop.eup %2586  ;;  %2594 = vpow2.f32 %v933_v51  ;;  %v931_v27 = vmul.f32 1.442695, %v874_v45  ;;  %v935_v35 = vmul.f32 1.442695, %v876_v15 }
 0x148   : > { %v939_v39 = vmul.f32 1.442695, %v878_v48  ;;  %v984_v10 = vrot.slane %v983_v55, 4  ;;  %v991_v61 = vadd.f32 %v3290_v33, %v990_v50  ;;  %2596 = vpow2.f32 %v937_v38  ;;  %v3301_v53 = vpop.f32.mrb[43].mxu0 }
 0x149   : > { %v943_v14 = vmul.f32 1.442695, %v880_v49  ;;  %2598 = vpow2.f32 %v941_v43  ;;  %v1101_v22 = vmax.f32 %v3273_v26, %v3278_v36  ;;  %v1104_v16 = vmax.f32 %v3296_v6, %v3301_v53 }
 0x14a   : > { %v3303_v3 = vpop.eup %2588  ;;  %v1026_v24 = vmul.f32 %v3236_v42, %v3155_v23  ;;  %v985_v32 = vadd.f32 %v984_v10, %v983_v55  ;;  %v992_v20 = vadd.f32 %v3298_v4, %v991_v61  ;;  %2600 = vpow2.f32 %v931_v27 }
 0x14b   : > { %v3312_v11 = vpop.f32.mrb[44].mxu0  ;;  %v3314_v34 = vmul.f32 0.17677669, %v1024_v8  ;;  %2602 = vpow2.f32 %v935_v35  ;;  %1102 = vmax.xlane.f32.xlu0 %v1101_v22  ;;  %1105 = vmax.xlane.f32.xlu1 %v1104_v16  ;;  %v1023_v43 = vmul.f32 %v3222_v19, %v3125_v59  ;;  %v1025_v23 = vmul.f32 %v3222_v19, %v3132_v2  ;;  %v262_v2 = vld [vmem:[%s3955_s1 + $0x130] sm:$0xff] }
 0x14c   : > { %v3316_v51 = vpop.f32.mrb[45].mxu0  ;;  %v3318_v38 = vmul.f32 0.17677669, %v1026_v24  ;;  %v986_v42 = vrot.slane %v985_v32, 2  ;;  %v993_v45 = vrot.slane %v992_v20, 4  ;;  %2604 = vpow2.f32 %v939_v39  ;;  %2361 = vmatmul.mubr.msk.f32.gmra.mrb[76].mxu0 %vm274_vm1, %v262_v2 }
 0x14d   : > { %4003 = vst [vmem:[#allocation9_spill] sm:$0xff] %v3314_v34  ;;  %v1107_v15 = vmax.f32 %v3312_v11, %v3316_v51  ;;  %v3328_v55 = vmul.f32 0.17677669, %v1023_v43  ;;  %v3330_v50 = vmul.f32 0.17677669, %v1025_v23  ;;  %2606 = vpow2.f32 %v943_v14  ;;  %722 = vmatprep.mubr.f32.mxu0 %v3960_v0 }
 0x14e   : > { %4004 = vst [vmem:[#allocation10_spill] sm:$0xff] %v3318_v38  ;;  %v2591_v8 = vpop.eup %2590  ;;  %v987_v49 = vadd.f32 %v986_v42, %v985_v32  ;;  %v994_v27 = vadd.f32 %v993_v45, %v992_v20  ;;  %v1028_v61 = vmul.f32 %v3303_v3, %v3172_v52  ;;  %v1031_v22 = vmul.f32 %v3303_v3, %v3177_v62 }
 0x14f   : > { %4005 = vst [vmem:[#allocation11_spill] sm:$0xff] %v3328_v55  ;;  %4006 = vst [vmem:[#allocation12_spill] sm:$0xff] %v3330_v50  ;;  %v3332_v59 = vpop.f32.mrb[46].mxu0  ;;  %v1030_v19 = vmul.f32 %v2591_v8, %v3188_v17  ;;  %v1032_v35 = vmul.f32 %v2591_v8, %v3194_v58  ;;  %1108 = vmax.xlane.f32.xlu0 %v1107_v15  ;;  %v1034_v62 = vmul.f32 %v2591_v8, %v3200_v31 }
 0x150   : > { %v3339_v39 = vpop.f32.mrb[47].mxu0  ;;  %v3348_v16 = vpop.eup %2592  ;;  %v988_v17 = vrot.slane %v987_v49, 1  ;;  %v995_v24 = vrot.slane %v994_v27, 2  ;;  %v3359_v43 = vmul.f32 0.17677669, %v1028_v61 }
 0x151   : > { %v1110_v58 = vmax.f32 %v3332_v59, %v3339_v39  ;;  %v3353_v14 = vmul.f32 0.17677669, %v1030_v19  ;;  %v3355_v32 = vpop.eup %2594  ;;  %v3357_v20 = vmul.f32 0.17677669, %v1032_v35  ;;  %v3361_v52 = vmul.f32 0.17677669, %v1031_v22 }
 0x152   : > { %4009 = vst [vmem:[#allocation15_spill] sm:$0xff] %v3359_v43  ;;  %v3364_v23 = vpop.eup %2596  ;;  %v989_v42 = vadd.f32 %v988_v17, %v987_v49  ;;  %v996_v45 = vadd.f32 %v995_v24, %v994_v27  ;;  %v999_v15 = vadd.f32 %v3355_v32, %v3348_v16  ;;  %v263_v19 = vld [vmem:[%s3955_s1 + $0x138] sm:$0xff]  ;;  %v1036_v35 = vmul.f32 %v2591_v8, %v3212_v47 }
 0x153   : > { %4007 = vst [vmem:[#allocation13_spill] sm:$0xff] %v3353_v14  ;;  %4008 = vst [vmem:[#allocation14_spill] sm:$0xff] %v3357_v20  ;;  %1111 = vmax.xlane.f32.xlu1 %v1110_v58  ;;  %v3368_v2 = vpop.f32.mrb[48].mxu0  ;;  %v3374_v61 = vpop.eup %2598  ;;  %2362 = vmatmul.mubr.msk.f32.gmra.mrb[78].mxu0 %vm274_vm1, %v263_v19  ;;  %v3383_v27 = vmul.f32 0.17677669, %v1034_v62  ;;  %v1033_v17 = vmul.f32 %v3303_v3, %v3180_v9  ;;  %v264_v19 = vld [vmem:[%s3955_s1 + $0x140] sm:$0xff]  ;;  %v1035_v9 = vmul.f32 %v3303_v3, %v3184_v56 }
 0x154   : > { %4010 = vst [vmem:[#allocation16_spill] sm:$0xff] %v3361_v52  ;;  %v3376_v22 = vpop.f32.mrb[49].mxu0  ;;  %v3387_v24 = vpop.eup %2600  ;;  %2608 = vrcp.f32 %v989_v42  ;;  %v997_v47 = vrot.slane %v996_v45, 1  ;;  %v1000_v8 = vadd.f32 %v3364_v23, %v999_v15  ;;  %728 = vmatprep.mubr.f32.mxu0 %v3960_v0  ;;  %v3398_v49 = vmul.f32 0.17677669, %v1036_v35  ;;  %v268_v14 = vld [vmem:[%s3955_s1 + $0x160] sm:$0xff] }
 0x155   : > { %4011 = vst [vmem:[#allocation17_spill] sm:$0xff] %v3383_v27  ;;  %v1113_v58 = vmax.f32 %v3368_v2, %v3376_v22  ;;  %v3396_v62 = vpop.eup %2602  ;;  %v3402_v42 = vmul.f32 0.17677669, %v1033_v17  ;;  %v3416_v3 = vmul.f32 0.17677669, %v1035_v9 }
 0x156   : > { %4012 = vst [vmem:[#allocation18_spill] sm:$0xff] %v3398_v49  ;;  %v998_v31 = vadd.f32 %v997_v47, %v996_v45  ;;  %v1001_v15 = vadd.f32 %v3374_v61, %v1000_v8  ;;  %v1008_v10 = vadd.f32 %v3396_v62, %v3387_v24  ;;  %v3409_v44 = vpop.eup %2604  ;;  %v265_v47 = vld [vmem:[%s3955_s1 + $0x148] sm:$0xff]  ;;  %v4015_v49 = vmov 0.0  }
 0x157   : > { %4013 = vst [vmem:[#allocation19_spill] sm:$0xff] %v3402_v42  ;;  %1114 = vmax.xlane.f32.xlu0 %v1113_v58  ;;  %v3407_v48 = vpop.f32.mrb[50].mxu0  ;;  %2363 = vmatmul.mubr.msk.f32.gmra.mrb[80].mxu0 %vm274_vm1, %v264_v19  ;;  %4014 = vst [vmem:[#allocation20_spill] sm:$0xff] %v3416_v3  ;;  %v3425_v8 = vpop.eup %2606 }
 0x158   : > { %v3411_v30 = vpop.f32.mrb[51].mxu0  ;;  %2610 = vrcp.f32 %v998_v31  ;;  %v1002_v45 = vrot.slane %v1001_v15, 4  ;;  %v1009_v35 = vadd.f32 %v3409_v44, %v1008_v10  ;;  %734 = vmatprep.mubr.f32.mxu0 %v3960_v0 }
 0x159   : > { %v1116_v17 = vmax.f32 %v3407_v48, %v3411_v30 }
 0x15a   : > { %v1003_v19 = vadd.f32 %v1002_v45, %v1001_v15  ;;  %v1010_v31 = vadd.f32 %v3425_v8, %v1009_v35  ;;  %v266_v45 = vld [vmem:[%s3955_s1 + $0x150] sm:$0xff] }
 0x15b   : > { %1117 = vmax.xlane.f32.xlu1 %v1116_v17  ;;  %v3430_v9 = vpop.f32.mrb[52].mxu0  ;;  %2364 = vmatmul.mubr.msk.f32.gmra.mrb[82].mxu0 %vm274_vm1, %v265_v47 }
 0x15c   : > { %v3432_v10 = vpop.f32.mrb[53].mxu0  ;;  %v1004_v56 = vrot.slane %v1003_v19, 2  ;;  %v1011_v0 = vrot.slane %v1010_v31, 4  ;;  %740 = vmatprep.mubr.f32.mxu0 %v4015_v49 }
 0x15d   : > { %v1119_v27 = vmax.f32 %v3430_v9, %v3432_v10 }
 0x15e   : > { %v2609_v43 = vpop.eup %2608  ;;  %v1005_v52 = vadd.f32 %v1004_v56, %v1003_v19  ;;  %v1012_v58 = vadd.f32 %v1011_v0, %v1010_v31  ;;  %v267_v31 = vld [vmem:[%s3955_s1 + $0x158] sm:$0xff] }
 0x15f   : > { %1120 = vmax.xlane.f32.xlu0 %v1119_v27  ;;  %v3438_v15 = vpop.f32.mrb[54].mxu0  ;;  %2365 = vmatmul.mubr.msk.f32.gmra.mrb[84].mxu0 %vm274_vm1, %v266_v45  ;;  %v1038_v17 = vmul.f32 %v2609_v43, %v3252_v54  ;;  %v1041_v47 = vmul.f32 %v2609_v43, %v3258_v12  ;;  %v1043_v42 = vmul.f32 %v2609_v43, %v3266_v18 }
 0x160   : > { %v3443_v35 = vpop.f32.mrb[55].mxu0  ;;  %v1045_v56 = vmul.f32 %v2609_v43, %v3275_v28  ;;  %v1006_v0 = vrot.slane %v1005_v52, 1  ;;  %v1013_v27 = vrot.slane %v1012_v58, 2  ;;  %2366 = vmatmul.mubr.msk.f32.vlgmr.msra.gmra.mrb[0].mxu1 %vm274_vm1, %v267_v31 }
 0x161   : > { %v1122_v19 = vmax.f32 %v3438_v15, %v3443_v35  ;;  %v3456_v45 = vmul.f32 0.17677669, %v1038_v17  ;;  %v3458_v54 = vmul.f32 0.17677669, %v1041_v47  ;;  %v3460_v12 = vmul.f32 0.17677669, %v1043_v42  ;;  %752 = vmatprep.mubr.f32.mxu1 %v4015_v49 }
 0x162   : > { %v2611_v18 = vpop.eup %2610  ;;  %v1007_v3 = vadd.f32 %v1006_v0, %v1005_v52  ;;  %v1014_v28 = vadd.f32 %v1013_v27, %v1012_v58  ;;  %v3468_v20 = vmul.f32 0.17677669, %v1045_v56 }
 0x163   : > { %4016 = vst [vmem:[#allocation21_spill] sm:$0xff] %v3456_v45  ;;  %4017 = vst [vmem:[#allocation22_spill] sm:$0xff] %v3458_v54  ;;  %1123 = vmax.xlane.f32.xlu1 %v1122_v19  ;;  %v3462_v43 = vpop.f32.mrb[56].mxu0  ;;  %v1040_v47 = vmul.f32 %v2611_v18, %v3282_v37  ;;  %v1042_v42 = vmul.f32 %v2611_v18, %v3285_v25  ;;  %v1044_v58 = vmul.f32 %v2611_v18, %v3290_v33  ;;  %v269_v33 = vld [vmem:[%s3955_s1 + $0x168] sm:$0xff] }
 0x164   : > { %4018 = vst [vmem:[#allocation23_spill] sm:$0xff] %v3460_v12  ;;  %4019 = vst [vmem:[#allocation24_spill] sm:$0xff] %v3468_v20  ;;  %v3470_v17 = vpop.f32.mrb[57].mxu0  ;;  %2612 = vrcp.f32 %v1007_v3  ;;  %v1015_v0 = vrot.slane %v1014_v28, 1  ;;  %v1046_v19 = vmul.f32 %v2611_v18, %v3298_v4  ;;  %2367 = vmatmul.mubr.msk.f32.gmra.mrb[2].mxu1 %vm274_vm1, %v268_v14 }
 0x165   : > { %v1125_v27 = vmax.f32 %v3462_v43, %v3470_v17  ;;  %v3481_v56 = vmul.f32 0.17677669, %v1040_v47  ;;  %v3483_v31 = vmul.f32 0.17677669, %v1042_v42  ;;  %758 = vmatprep.mubr.f32.mxu1 %v4015_v49  ;;  %v3493_v4 = vmul.f32 0.17677669, %v1044_v58 }
 0x166   : > { %v1016_v25 = vadd.f32 %v1015_v0, %v1014_v28  ;;  %v3495_v14 = vmul.f32 0.17677669, %v1046_v19  ;;  %v270_v0 = vld [vmem:[%s3955_s1 + $0x170] sm:$0xff] }
 0x167   : > { %4020 = vst [vmem:[#allocation25_spill] sm:$0xff] %v3481_v56  ;;  %4021 = vst [vmem:[#allocation26_spill] sm:$0xff] %v3483_v31  ;;  %1126 = vmax.xlane.f32.xlu0 %v1125_v27  ;;  %v3487_v52 = vpop.f32.mrb[58].mxu0 }
 0x168   : > { %4022 = vst [vmem:[#allocation27_spill] sm:$0xff] %v3493_v4  ;;  %4023 = vst [vmem:[#allocation28_spill] sm:$0xff] %v3495_v14  ;;  %v3497_v3 = vpop.f32.mrb[59].mxu0  ;;  %2614 = vrcp.f32 %v1016_v25  ;;  %2368 = vmatmul.mubr.msk.f32.gmra.mrb[4].mxu1 %vm274_vm1, %v269_v33  ;;  %v271_v33 = vld [vmem:[%s3955_s1 + $0x178] sm:$0xff] }
 0x169   : > { %v1128_v28 = vmax.f32 %v3487_v52, %v3497_v3  ;;  %764 = vmatprep.mubr.f32.mxu1 %v4015_v49 }
 0x16b   : > { %1129 = vmax.xlane.f32.xlu1 %v1128_v28  ;;  %v3506_v42 = vpop.f32.mrb[60].mxu0 }
 0x16c   : > { %v3509_v58 = vpop.f32.mrb[61].mxu0  ;;  %2369 = vmatmul.mubr.msk.f32.gmra.mrb[6].mxu1 %vm274_vm1, %v270_v0 }
 0x16d   : > { %v1131_v27 = vmax.f32 %v3506_v42, %v3509_v58  ;;  %770 = vmatprep.mubr.f32.mxu1 %v4015_v49 }
 0x16e   : > { %v2613_v19 = vpop.eup %2612 }
 0x16f   : > { %1132 = vmax.xlane.f32.xlu0 %v1131_v27  ;;  %v3517_v25 = vpop.f32.mrb[62].mxu0  ;;  %v1048_v37 = vmul.f32 %v2613_v19, %v3348_v16  ;;  %v1051_v47 = vmul.f32 %v2613_v19, %v3355_v32  ;;  %v1053_v18 = vmul.f32 %v2613_v19, %v3364_v23  ;;  %v1055_v0 = vmul.f32 %v2613_v19, %v3374_v61 }
 0x170   : > { %v3523_v28 = vpop.f32.mrb[63].mxu0  ;;  %2370 = vmatmul.mubr.msk.f32.gmra.mrb[8].mxu1 %vm274_vm1, %v271_v33 }
 0x171   : > { %v1134_v27 = vmax.f32 %v3517_v25, %v3523_v28  ;;  %v3532_v12 = vmul.f32 0.17677669, %v1048_v37  ;;  %v3534_v20 = vmul.f32 0.17677669, %v1051_v47  ;;  %v3536_v4 = vmul.f32 0.17677669, %v1053_v18 }
 0x172   : > { %v2615_v14 = vpop.eup %2614  ;;  %v3538_v16 = vmul.f32 0.17677669, %v1055_v0 }
 0x173   : > { %4024 = vst [vmem:[#allocation29_spill] sm:$0xff] %v3532_v12  ;;  %4025 = vst [vmem:[#allocation30_spill] sm:$0xff] %v3534_v20  ;;  %1135 = vmax.xlane.f32.xlu1 %v1134_v27  ;;  %v1050_v32 = vmul.f32 %v2615_v14, %v3387_v24  ;;  %v1052_v23 = vmul.f32 %v2615_v14, %v3396_v62  ;;  %v1054_v19 = vmul.f32 %v2615_v14, %v3409_v44 }
 0x174   : > { %4026 = vst [vmem:[#allocation31_spill] sm:$0xff] %v3536_v4  ;;  %4027 = vst [vmem:[#allocation32_spill] sm:$0xff] %v3538_v16  ;;  %v1056_v37 = vmul.f32 %v2615_v14, %v3425_v8 }
 0x175   : > { %v3548_v18 = vmul.f32 0.17677669, %v1050_v32  ;;  %v3550_v33 = vmul.f32 0.17677669, %v1052_v23  ;;  %v3552_v0 = vmul.f32 0.17677669, %v1054_v19 }
 0x176   : > { %v3554_v27 = vmul.f32 0.17677669, %v1056_v37 }
 0x177   : > { %4028 = vst [vmem:[#allocation33_spill] sm:$0xff] %v3548_v18  ;;  %4029 = vst [vmem:[#allocation34_spill] sm:$0xff] %v3550_v33 }
 0x178   : > { %4030 = vst [vmem:[#allocation35_spill] sm:$0xff] %v3552_v0  ;;  %4031 = vst [vmem:[#allocation36_spill] sm:$0xff] %v3554_v27 }
 0x1c8   : > { %v1091_v44 = vpop.xlane.xlu0 %1090 }
 0x1c9   : > { %v1137_v8 = vsub.f32 %v3206_v40, %v1091_v44  ;;  %v1138_v14 = vsub.f32 %v3210_v46, %v1091_v44 }
 0x1cb   : > { %v1169_v47 = vmul.f32 1.442695, %v1137_v8  ;;  %v1171_v32 = vmul.f32 1.442695, %v1138_v14 }
 0x1cc   : > { %v1097_v61 = vpop.xlane.xlu1 %1096  ;;  %v1094_v23 = vpop.xlane.xlu0 %1093 }
 0x1cd   : > { %v1141_v19 = vsub.f32 %v3228_v29, %v1097_v61  ;;  %v1142_v37 = vsub.f32 %v3230_v21, %v1097_v61  ;;  %2616 = vpow2.f32 %v1169_v47  ;;  %v1139_v4 = vsub.f32 %v3218_v5, %v1094_v23 }
 0x1ce   : > { %v1140_v24 = vsub.f32 %v3220_v63, %v1094_v23  ;;  %2618 = vpow2.f32 %v1171_v32 }
 0x1cf   : > { %v1177_v62 = vmul.f32 1.442695, %v1141_v19  ;;  %v1173_v16 = vmul.f32 1.442695, %v1139_v4  ;;  %v1179_v40 = vmul.f32 1.442695, %v1142_v37 }
 0x1d0   : > { %v1175_v0 = vmul.f32 1.442695, %v1140_v24  ;;  %v1100_v27 = vpop.xlane.xlu1 %1099 }
 0x1d1   : > { %2620 = vpow2.f32 %v1177_v62  ;;  %v1143_v46 = vsub.f32 %v3240_v41, %v1100_v27  ;;  %v1144_v44 = vsub.f32 %v3246_v57, %v1100_v27 }
 0x1d2   : > { %2622 = vpow2.f32 %v1173_v16 }
 0x1d3   : > { %2624 = vpow2.f32 %v1175_v0  ;;  %v1181_v29 = vmul.f32 1.442695, %v1143_v46  ;;  %v1183_v21 = vmul.f32 1.442695, %v1144_v44 }
 0x1d4   : > { %2626 = vpow2.f32 %v1179_v40 }
 0x1d5   : > { %2628 = vpow2.f32 %v1181_v29 }
 0x1d6   : > { %2630 = vpow2.f32 %v1183_v21 }
 0x1d7   : > { %v3568_v5 = vpop.eup %2616 }
 0x1d8   : > { %v3570_v63 = vpop.eup %2618  ;;  %v1103_v4 = vpop.xlane.xlu0 %1102 }
 0x1d9   : > { %v1106_v61 = vpop.xlane.xlu1 %1105  ;;  %v1145_v47 = vsub.f32 %v3273_v26, %v1103_v4  ;;  %v1146_v24 = vsub.f32 %v3278_v36, %v1103_v4  ;;  %v1233_v41 = vadd.f32 %v3570_v63, %v3568_v5 }
 0x1da   : > { %v1147_v57 = vsub.f32 %v3296_v6, %v1106_v61  ;;  %v1148_v0 = vsub.f32 %v3301_v53, %v1106_v61 }
 0x1db   : > { %v3577_v16 = vpop.eup %2620  ;;  %v1185_v62 = vmul.f32 1.442695, %v1145_v47  ;;  %v1187_v8 = vmul.f32 1.442695, %v1146_v24  ;;  %1234 = vadd.xlane.f32.xlu0 %v1233_v41 }
 0x1dc   : > { %v3580_v27 = vpop.eup %2622  ;;  %v1189_v14 = vmul.f32 1.442695, %v1147_v57  ;;  %v1191_v26 = vmul.f32 1.442695, %v1148_v0  ;;  %v1109_v23 = vpop.xlane.xlu0 %1108 }
 0x1dd   : > { %v3582_v32 = vpop.eup %2624  ;;  %2632 = vpow2.f32 %v1185_v62  ;;  %v1149_v19 = vsub.f32 %v3312_v11, %v1109_v23  ;;  %v1150_v53 = vsub.f32 %v3316_v51, %v1109_v23 }
 0x1de   : > { %v3584_v36 = vpop.eup %2626  ;;  %v1236_v6 = vadd.f32 %v3582_v32, %v3580_v27  ;;  %2634 = vpow2.f32 %v1187_v8 }
 0x1df   : > { %v3590_v37 = vpop.eup %2628  ;;  %v1239_v40 = vadd.f32 %v3584_v36, %v3577_v16  ;;  %2636 = vpow2.f32 %v1189_v14  ;;  %v1193_v44 = vmul.f32 1.442695, %v1149_v19  ;;  %v1195_v29 = vmul.f32 1.442695, %v1150_v53 }
 0x1e0   : > { %v3594_v46 = vpop.eup %2630  ;;  %1237 = vadd.xlane.f32.xlu1 %v1236_v6  ;;  %v1112_v21 = vpop.xlane.xlu1 %1111  ;;  %2638 = vpow2.f32 %v1191_v26 }
 0x1e1   : > { %1240 = vadd.xlane.f32.xlu0 %v1239_v40  ;;  %v1151_v4 = vsub.f32 %v3332_v59, %v1112_v21  ;;  %v1152_v11 = vsub.f32 %v3339_v39, %v1112_v21  ;;  %v1242_v51 = vadd.f32 %v3594_v46, %v3590_v37  ;;  %2640 = vpow2.f32 %v1193_v44 }
 0x1e2   : > { %2642 = vpow2.f32 %v1195_v29 }
 0x1e3   : > { %v1197_v61 = vmul.f32 1.442695, %v1151_v4  ;;  %v1199_v47 = vmul.f32 1.442695, %v1152_v11 }
 0x1e4   : > { %1243 = vadd.xlane.f32.xlu1 %v1242_v51  ;;  %v1115_v24 = vpop.xlane.xlu0 %1114 }
 0x1e5   : > { %2644 = vpow2.f32 %v1197_v61  ;;  %v1153_v41 = vsub.f32 %v3368_v2, %v1115_v24  ;;  %v1154_v57 = vsub.f32 %v3376_v22, %v1115_v24 }
 0x1e6   : > { %2646 = vpow2.f32 %v1199_v47 }
 0x1e7   : > { %v1201_v0 = vmul.f32 1.442695, %v1153_v41  ;;  %v1203_v62 = vmul.f32 1.442695, %v1154_v57  ;;  %v3602_v59 = vpop.eup %2632 }
 0x1e8   : > { %v1118_v39 = vpop.xlane.xlu1 %1117  ;;  %v3604_v8 = vpop.eup %2634 }
 0x1e9   : > { %2648 = vpow2.f32 %v1201_v0  ;;  %v1155_v14 = vsub.f32 %v3407_v48, %v1118_v39  ;;  %v1156_v26 = vsub.f32 %v3411_v30, %v1118_v39  ;;  %v3608_v23 = vpop.eup %2636  ;;  %v1245_v2 = vadd.f32 %v3604_v8, %v3602_v59 }
 0x1ea   : > { %2650 = vpow2.f32 %v1203_v62  ;;  %v3612_v22 = vpop.eup %2638 }
 0x1eb   : > { %v1205_v6 = vmul.f32 1.442695, %v1155_v14  ;;  %v1207_v19 = vmul.f32 1.442695, %v1156_v26  ;;  %v3614_v53 = vpop.eup %2640  ;;  %1246 = vadd.xlane.f32.xlu0 %v1245_v2  ;;  %v1248_v40 = vadd.f32 %v3612_v22, %v3608_v23 }
 0x1ec   : > { %v1121_v44 = vpop.xlane.xlu0 %1120  ;;  %v3618_v48 = vpop.eup %2642 }
 0x1ed   : > { %2652 = vpow2.f32 %v1205_v6  ;;  %v1157_v30 = vsub.f32 %v3430_v9, %v1121_v44  ;;  %v1158_v29 = vsub.f32 %v3432_v10, %v1121_v44  ;;  %1249 = vadd.xlane.f32.xlu1 %v1248_v40  ;;  %v1251_v21 = vadd.f32 %v3618_v48, %v3614_v53 }
 0x1ee   : > { %2654 = vpow2.f32 %v1207_v19 }
 0x1ef   : > { %v3624_v4 = vpop.eup %2644  ;;  %v1209_v11 = vmul.f32 1.442695, %v1157_v30  ;;  %v1211_v51 = vmul.f32 1.442695, %v1158_v29  ;;  %1252 = vadd.xlane.f32.xlu0 %v1251_v21 }
 0x1f0   : > { %v3626_v61 = vpop.eup %2646  ;;  %v1124_v47 = vpop.xlane.xlu1 %1123 }
 0x1f1   : > { %2656 = vpow2.f32 %v1209_v11  ;;  %v1159_v24 = vsub.f32 %v3438_v15, %v1124_v47  ;;  %v1160_v9 = vsub.f32 %v3443_v35, %v1124_v47  ;;  %v1254_v10 = vadd.f32 %v3626_v61, %v3624_v4 }
 0x1f2   : > { %2658 = vpow2.f32 %v1211_v51 }
 0x1f3   : > { %v3632_v41 = vpop.eup %2648  ;;  %v1213_v57 = vmul.f32 1.442695, %v1159_v24  ;;  %v1215_v0 = vmul.f32 1.442695, %v1160_v9  ;;  %1255 = vadd.xlane.f32.xlu1 %v1254_v10 }
 0x1f4   : > { %v3634_v62 = vpop.eup %2650  ;;  %v1127_v39 = vpop.xlane.xlu0 %1126 }
 0x1f5   : > { %2660 = vpow2.f32 %v1213_v57  ;;  %v1161_v14 = vsub.f32 %v3462_v43, %v1127_v39  ;;  %v1162_v26 = vsub.f32 %v3470_v17, %v1127_v39  ;;  %v1257_v15 = vadd.f32 %v3634_v62, %v3632_v41 }
 0x1f6   : > { %2662 = vpow2.f32 %v1215_v0 }
 0x1f7   : > { %v3640_v35 = vpop.eup %2652  ;;  %v1217_v2 = vmul.f32 1.442695, %v1161_v14  ;;  %v1219_v6 = vmul.f32 1.442695, %v1162_v26  ;;  %1258 = vadd.xlane.f32.xlu0 %v1257_v15 }
 0x1f8   : > { %v3642_v19 = vpop.eup %2654  ;;  %v1130_v40 = vpop.xlane.xlu1 %1129 }
 0x1f9   : > { %2664 = vpow2.f32 %v1217_v2  ;;  %v1163_v44 = vsub.f32 %v3487_v52, %v1130_v40  ;;  %v1164_v30 = vsub.f32 %v3497_v3, %v1130_v40  ;;  %v1260_v43 = vadd.f32 %v3642_v19, %v3640_v35  ;;  %v3670_v40 = vpop.f32.mrb[64].mxu0 }
 0x1fa   : > { %2666 = vpow2.f32 %v1219_v6 }
 0x1fb   : > { %v3648_v17 = vpop.eup %2656  ;;  %v1221_v29 = vmul.f32 1.442695, %v1163_v44  ;;  %v1223_v21 = vmul.f32 1.442695, %v1164_v30  ;;  %1261 = vadd.xlane.f32.xlu1 %v1260_v43 }
 0x1fc   : > { %v3650_v11 = vpop.eup %2658  ;;  %v1133_v51 = vpop.xlane.xlu0 %1132 }
 0x1fd   : > { %2668 = vpow2.f32 %v1221_v29  ;;  %v1165_v47 = vsub.f32 %v3506_v42, %v1133_v51  ;;  %v1166_v24 = vsub.f32 %v3509_v58, %v1133_v51  ;;  %v1263_v52 = vadd.f32 %v3650_v11, %v3648_v17 }
 0x1fe   : > { %2670 = vpow2.f32 %v1223_v21 }
 0x1ff   : > { %v3656_v3 = vpop.eup %2660  ;;  %v1225_v9 = vmul.f32 1.442695, %v1165_v47  ;;  %v1227_v10 = vmul.f32 1.442695, %v1166_v24  ;;  %1264 = vadd.xlane.f32.xlu0 %v1263_v52 }
 0x200   : > { %v3658_v57 = vpop.eup %2662  ;;  %v1136_v0 = vpop.xlane.xlu1 %1135 }
 0x201   : > { %2672 = vpow2.f32 %v1225_v9  ;;  %v1167_v39 = vsub.f32 %v3517_v25, %v1136_v0  ;;  %v1168_v14 = vsub.f32 %v3523_v28, %v1136_v0  ;;  %v1266_v42 = vadd.f32 %v3658_v57, %v3656_v3  ;;  %v684_v28 = vpop.f32.mrb[65].mxu0 }
 0x202   : > { %2674 = vpow2.f32 %v1227_v10  ;;  %v1330_v30 = vmul.f32 0.00390625, %v684_v28  ;;  %v3676_v43 = vpop.f32.mrb[66].mxu0 }
 0x203   : > { %v3664_v58 = vpop.eup %2664  ;;  %v1229_v26 = vmul.f32 1.442695, %v1167_v39  ;;  %v1231_v15 = vmul.f32 1.442695, %v1168_v14  ;;  %1267 = vadd.xlane.f32.xlu1 %v1266_v42  ;;  %v3682_v51 = vpop.f32.mrb[67].mxu0 }
 0x204   : > { %v3666_v2 = vpop.eup %2666  ;;  %1425 = vmatprep.mubr.f32.mxu1 %v1330_v30  ;;  %v3688_v52 = vpop.f32.mrb[68].mxu0 }
 0x205   : > { %2676 = vpow2.f32 %v1229_v26  ;;  %v1269_v6 = vadd.f32 %v3666_v2, %v3664_v58  ;;  %v3692_v10 = vpop.f32.mrb[69].mxu0 }
 0x206   : > { %2678 = vpow2.f32 %v1231_v15  ;;  %v3698_v14 = vpop.f32.mrb[70].mxu0 }
 0x207   : > { %v3672_v25 = vpop.eup %2668  ;;  %1270 = vadd.xlane.f32.xlu0 %v1269_v6  ;;  %v3700_v42 = vpop.f32.mrb[71].mxu0 }
 0x208   : > { %v3674_v44 = vpop.eup %2670  ;;  %v3702_v26 = vpop.f32.mrb[72].mxu0 }
 0x209   : > { %v1272_v29 = vadd.f32 %v3674_v44, %v3672_v25  ;;  %v3704_v15 = vpop.f32.mrb[73].mxu0 }
 0x20a   : > { %v3706_v6 = vpop.f32.mrb[74].mxu0 }
 0x20b   : > { %v3680_v21 = vpop.eup %2672  ;;  %1273 = vadd.xlane.f32.xlu1 %v1272_v29  ;;  %v3708_v28 = vpop.f32.mrb[75].mxu0 }
 0x20c   : > { %4032 = vst [vmem:[#allocation37_spill] sm:$0xff] %v3680_v21  ;;  %v3684_v47 = vpop.eup %2674 }
 0x20d   : > { %v1275_v24 = vadd.f32 %v3684_v47, %v3680_v21 }
 0x20f   : > { %v3690_v9 = vpop.eup %2676  ;;  %1276 = vadd.xlane.f32.xlu0 %v1275_v24 }
 0x210   : > { %4033 = vst [vmem:[#allocation38_spill] sm:$0xff] %v3690_v9  ;;  %v3694_v0 = vpop.eup %2678 }
 0x211   : > { %v1278_v39 = vadd.f32 %v3694_v0, %v3690_v9 }
 0x213   : > { %1279 = vadd.xlane.f32.xlu1 %v1278_v39 }
 0x21f   : > { %v3710_v30 = vpop.f32.mrb[76].mxu0 }
 0x220   : > { %v3712_v29 = vpop.f32.mrb[77].mxu0 }
 0x226   : > { %v3714_v24 = vpop.f32.mrb[78].mxu0 }
 0x227   : > { %v3716_v12 = vpop.f32.mrb[79].mxu0 }
 0x22a   : > { %v3718_v20 = vpop.f32.mrb[80].mxu0 }
 0x22b   : > { %v3720_v18 = vpop.f32.mrb[81].mxu0 }
 0x22e   : > { %v3722_v39 = vpop.f32.mrb[82].mxu0 }
 0x22f   : > { %4034 = vst [vmem:[#allocation39_spill] sm:$0xff] %v3722_v39  ;;  %v3724_v33 = vpop.f32.mrb[83].mxu0 }
 0x232   : > { %v3726_v45 = vpop.f32.mrb[84].mxu0 }
 0x233   : > { %4035 = vst [vmem:[#allocation40_spill] sm:$0xff] %v3726_v45  ;;  %v3728_v54 = vpop.f32.mrb[85].mxu0  ;;  %v3730_v56 = vpop.f32.mrb[0].mxu1 }
 0x234   : > { %4036 = vst [vmem:[#allocation41_spill] sm:$0xff] %v3730_v56  ;;  %v3732_v31 = vpop.f32.mrb[1].mxu1 }
 0x235   : > { %4037 = vst [vmem:[#allocation42_spill] sm:$0xff] %v3732_v31 }
 0x237   : > { %v3734_v49 = vpop.f32.mrb[2].mxu1 }
 0x238   : > { %4038 = vst [vmem:[#allocation43_spill] sm:$0xff] %v3734_v49  ;;  %v3736_v55 = vpop.f32.mrb[3].mxu1 }
 0x239   : > { %4039 = vst [vmem:[#allocation44_spill] sm:$0xff] %v3736_v55 }
 0x23b   : > { %v3738_v50 = vpop.f32.mrb[4].mxu1 }
 0x23c   : > { %4040 = vst [vmem:[#allocation45_spill] sm:$0xff] %v3738_v50  ;;  %v3740_v34 = vpop.f32.mrb[5].mxu1 }
 0x23d   : > { %4041 = vst [vmem:[#allocation46_spill] sm:$0xff] %v3740_v34 }
 0x23f   : > { %v3742_v38 = vpop.f32.mrb[6].mxu1 }
 0x240   : > { %4042 = vst [vmem:[#allocation47_spill] sm:$0xff] %v3742_v38  ;;  %v3744_v60 = vpop.f32.mrb[7].mxu1 }
 0x241   : > { %4043 = vst [vmem:[#allocation48_spill] sm:$0xff] %v3744_v60 }
 0x243   : > { %v3746_v1 = vpop.f32.mrb[8].mxu1 }
 0x244   : > { %4044 = vst [vmem:[#allocation49_spill] sm:$0xff] %v3746_v1  ;;  %v3748_v7 = vpop.f32.mrb[9].mxu1 }
 0x245   : > { %4045 = vst [vmem:[#allocation50_spill] sm:$0xff] %v3748_v7 }
 0x268   : > { %v1235_v13 = vpop.xlane.xlu0 %1234 }
 0x269   : > { %2680 = vrcp.f32 %v1235_v13 }
 0x26d   : > { %v1238_v56 = vpop.xlane.xlu1 %1237 }
 0x26e   : > { %2682 = vrcp.f32 %v1238_v56  ;;  %v1241_v45 = vpop.xlane.xlu0 %1240 }
 0x26f   : > { %2684 = vrcp.f32 %v1241_v45 }
 0x271   : > { %v1244_v49 = vpop.xlane.xlu1 %1243 }
 0x272   : > { %2686 = vrcp.f32 %v1244_v49 }
 0x273   : > { %v2681_v55 = vpop.eup %2680 }
 0x274   : > { %v1283_v34 = vmul.f32 %v2681_v55, %v3570_v63  ;;  %v1282_v60 = vmul.f32 %v2681_v55, %v3568_v5 }
 0x278   : > { %v2683_v50 = vpop.eup %2682  ;;  %v1247_v31 = vpop.xlane.xlu0 %1246 }
 0x279   : > { %v1286_v38 = vmul.f32 %v2683_v50, %v3582_v32  ;;  %v1285_v1 = vmul.f32 %v2683_v50, %v3580_v27  ;;  %v2685_v7 = vpop.eup %2684  ;;  %2688 = vrcp.f32 %v1247_v31 }
 0x27a   : > { %v1250_v21 = vpop.xlane.xlu1 %1249  ;;  %v1289_v45 = vmul.f32 %v2685_v7, %v3584_v36  ;;  %v1288_v50 = vmul.f32 %v2685_v7, %v3577_v16  ;;  %v1332_v7 = vmul.f32 0.00390625, %v3682_v51  ;;  %v1331_v51 = vmul.f32 0.00390625, %v3676_v43 }
 0x27b   : > { %v2394_v13 = vpack.c.bf16 %v1286_v38, %v1283_v34  ;;  %v2396_v56 = vpack.c.bf16 %v1285_v1, %v1282_v60  ;;  %2690 = vrcp.f32 %v1250_v21 }
 0x27c   : > { %v2687_v39 = vpop.eup %2686  ;;  %v1253_v49 = vpop.xlane.xlu0 %1252 }
 0x27d   : > { %2395 = vmatprep.subr.bf16.mxu1 %v2394_v13  ;;  %v1292_v9 = vmul.f32 %v2687_v39, %v3594_v46  ;;  %v1291_v63 = vmul.f32 %v2687_v39, %v3590_v37  ;;  %2692 = vrcp.f32 %v1253_v49  ;;  %v1329_v39 = vmul.f32 0.00390625, %v3670_v40 }
 0x27e   : > { %2397 = vmatpush1.bf16.xpose.msra.mxu1 %v2396_v56 }
 0x27f   : > { %v2398_v55 = vpack.c.bf16 %v1292_v9, %v1289_v45  ;;  %v2400_v34 = vpack.c.bf16 %v1291_v63, %v1288_v50 }
 0x280   : > { %v1256_v5 = vpop.xlane.xlu1 %1255 }
 0x281   : > { %2399 = vmatprep.subr.bf16.mxu1 %v2398_v55  ;;  %2694 = vrcp.f32 %v1256_v5 }
 0x283   : > { %v2689_v60 = vpop.eup %2688 }
 0x284   : > { %v1259_v1 = vpop.xlane.xlu0 %1258  ;;  %v1295_v31 = vmul.f32 %v2689_v60, %v3604_v8  ;;  %v1294_v37 = vmul.f32 %v2689_v60, %v3602_v59  ;;  %v1334_v59 = vmul.f32 0.00390625, %v3692_v10  ;;  %v1333_v10 = vmul.f32 0.00390625, %v3688_v52 }
 0x285   : > { %v2691_v38 = vpop.eup %2690  ;;  %2696 = vrcp.f32 %v1259_v1 }
 0x286   : > { %2401 = vmatpush1.bf16.xpose.msra.mxu1 %v2400_v34  ;;  %v1298_v27 = vmul.f32 %v2691_v38, %v3612_v22  ;;  %v1297_v32 = vmul.f32 %v2691_v38, %v3608_v23  ;;  %v1335_v34 = vmul.f32 0.00390625, %v3698_v14 }
 0x287   : > { %v2693_v46 = vpop.eup %2692 }
 0x288   : > { %v1262_v36 = vpop.xlane.xlu1 %1261  ;;  %v2402_v21 = vpack.c.bf16 %v1298_v27, %v1295_v31  ;;  %v2404_v16 = vpack.c.bf16 %v1297_v32, %v1294_v37  ;;  %v1301_v8 = vmul.f32 %v2693_v46, %v3618_v48  ;;  %v1300_v40 = vmul.f32 %v2693_v46, %v3614_v53 }
 0x289   : > { %2698 = vrcp.f32 %v1262_v36  ;;  %v1336_v48 = vmul.f32 0.00390625, %v3700_v42  ;;  %v1338_v53 = vmul.f32 0.00390625, %v3704_v15  ;;  %v1337_v15 = vmul.f32 0.00390625, %v3702_v26 }
 0x28a   : > { %2403 = vmatprep.subr.bf16.mxu1 %v2402_v21  ;;  %v1339_v32 = vmul.f32 0.00390625, %v3706_v6  ;;  %v1346_v6 = vmul.f32 0.00390625, %v3720_v18 }
 0x28b   : > { %v2695_v9 = vpop.eup %2694 }
 0x28c   : > { %v1265_v13 = vpop.xlane.xlu0 %1264  ;;  %v1304_v22 = vmul.f32 %v2695_v9, %v3626_v61  ;;  %v1303_v56 = vmul.f32 %v2695_v9, %v3624_v4  ;;  %v1345_v9 = vmul.f32 0.00390625, %v3718_v20  ;;  %v4049_v20 = vld [vmem:[#allocation42_spill] sm:$0xff] }
 0x28d   : > { %1426 = vmatmul.mubr.f32.vlgmr.msra.gmra.mrb[10].mxu1 %v1329_v39  ;;  %2700 = vrcp.f32 %v1265_v13 }
 0x28e   : > { %2405 = vmatpush1.bf16.xpose.msra.mxu1 %v2404_v16  ;;  %1430 = vmatprep.mubr.f32.mxu1 %v1332_v7  ;;  %v2406_v23 = vpack.c.bf16 %v1304_v22, %v1301_v8  ;;  %v2408_v61 = vpack.c.bf16 %v1303_v56, %v1300_v40  ;;  %v1343_v7 = vmul.f32 0.00390625, %v3714_v24  ;;  %v4047_v8 = vld [vmem:[#allocation39_spill] sm:$0xff]  ;;  %v4050_v56 = vld [vmem:[#allocation40_spill] sm:$0xff] }
 0x28f   : > { %v2697_v45 = vpop.eup %2696  ;;  %v1347_v22 = vmul.f32 0.00390625, %v4047_v8 }
 0x290   : > { %v1268_v49 = vpop.xlane.xlu1 %1267  ;;  %2407 = vmatprep.subr.bf16.mxu1 %v2406_v23  ;;  %v1307_v4 = vmul.f32 %v2697_v45, %v3634_v62  ;;  %v1306_v52 = vmul.f32 %v2697_v45, %v3632_v41  ;;  %v1340_v62 = vmul.f32 0.00390625, %v3708_v28  ;;  %v1342_v41 = vmul.f32 0.00390625, %v3712_v29  ;;  %v4053_v45 = vld [vmem:[#allocation8_spill] sm:$0xff] }
 0x291   : > { %1431 = vmatmul.mubr.f32.gmra.mrb[12].mxu1 %v1331_v51  ;;  %2702 = vrcp.f32 %v1268_v49  ;;  %v1341_v29 = vmul.f32 0.00390625, %v3710_v30  ;;  %v1352_v23 = vmul.f32 0.00390625, %v4049_v20  ;;  %v4051_v51 = vld [vmem:[#allocation44_spill] sm:$0xff]  ;;  %v4052_v49 = vld [vmem:[#allocation41_spill] sm:$0xff] }
 0x292   : > { %1435 = vmatprep.mubr.f32.mxu1 %v1334_v59  ;;  %v1351_v40 = vmul.f32 0.00390625, %v4052_v49  ;;  %v4091_v20 = vld [vmem:[#allocation28_spill] sm:$0xff] }
 0x293   : > { %v2699_v63 = vpop.eup %2698 }
 0x294   : > { %v1271_v55 = vpop.xlane.xlu0 %1270  ;;  %v1310_v43 = vmul.f32 %v2699_v63, %v3642_v19  ;;  %v1309_v50 = vmul.f32 %v2699_v63, %v3640_v35  ;;  %v4056_v63 = vld [vmem:[#allocation46_spill] sm:$0xff] }
 0x295   : > { %1436 = vmatmul.mubr.f32.gmra.mrb[14].mxu1 %v1333_v10  ;;  %2704 = vrcp.f32 %v1271_v55  ;;  %v1356_v10 = vmul.f32 0.00390625, %v4056_v63  ;;  %v4057_v55 = vld [vmem:[#allocation43_spill] sm:$0xff] }
 0x296   : > { %2409 = vmatpush1.bf16.xpose.msra.mxu1 %v2408_v61  ;;  %1440 = vmatprep.mubr.f32.mxu1 %v1336_v48  ;;  %v2410_v5 = vpack.c.bf16 %v1310_v43, %v1307_v4  ;;  %v2412_v19 = vpack.c.bf16 %v1309_v50, %v1306_v52  ;;  %v4054_v48 = vld [vmem:[#allocation7_spill] sm:$0xff]  ;;  %v1353_v4 = vmul.f32 0.00390625, %v4057_v55  ;;  %v4058_v43 = vld [vmem:[#allocation6_spill] sm:$0xff]  ;;  %v4061_v50 = vld [vmem:[#allocation48_spill] sm:$0xff] }
 0x297   : > { %v2701_v60 = vpop.eup %2700  ;;  %v4055_v61 = vpack.c.bf16 %v4053_v45, %v4054_v48  ;;  %v4098_v45 = vld [vmem:[#allocation33_spill] sm:$0xff] }
 0x298   : > { %v1274_v42 = vpop.xlane.xlu1 %1273  ;;  %2411 = vmatprep.subr.bf16.mxu1 %v2410_v5  ;;  %v1313_v35 = vmul.f32 %v2701_v60, %v3650_v11  ;;  %v1312_v26 = vmul.f32 %v2701_v60, %v3648_v17  ;;  %v1344_v11 = vmul.f32 0.00390625, %v3716_v12  ;;  %v4063_v60 = vld [vmem:[#allocation10_spill] sm:$0xff] }
 0x299   : > { %1441 = vmatmul.mubr.f32.gmra.mrb[16].mxu1 %v1335_v34  ;;  %2706 = vrcp.f32 %v1274_v42  ;;  %v1358_v34 = vmul.f32 0.00390625, %v4061_v50  ;;  %v4062_v42 = vld [vmem:[#allocation45_spill] sm:$0xff] }
 0x29a   : > { %1510 = vmatprep.mubr.f32.mxu1 %v1338_v53  ;;  %v4059_v53 = vld [vmem:[#allocation5_spill] sm:$0xff]  ;;  %v1355_v52 = vmul.f32 0.00390625, %v4062_v42  ;;  %v4104_v42 = vld [vmem:[#allocation35_spill] sm:$0xff] }
 0x29b   : > { %v2703_v1 = vpop.eup %2702  ;;  %v4060_v5 = vpack.c.bf16 %v4058_v43, %v4059_v53  ;;  %v4100_v53 = vld [vmem:[#allocation30_spill] sm:$0xff] }
 0x29c   : > { %v1277_v38 = vpop.xlane.xlu0 %1276  ;;  %v1316_v14 = vmul.f32 %v2703_v1, %v3658_v57  ;;  %v1315_v27 = vmul.f32 %v2703_v1, %v3656_v3  ;;  %v4066_v1 = vld [vmem:[#allocation12_spill] sm:$0xff] }
 0x29d   : > { %1511 = vmatmul.mubr.f32.vlgmr.msra.gmra.mrb[18].mxu1 %v1337_v15  ;;  %2708 = vrcp.f32 %v1277_v38  ;;  %v4067_v15 = vld [vmem:[#allocation11_spill] sm:$0xff] }
 0x29e   : > { %2413 = vmatpush1.bf16.xpose.msra.mxu1 %v2412_v19  ;;  %1515 = vmatprep.mubr.f32.mxu1 %v1340_v62  ;;  %v2414_v31 = vpack.c.bf16 %v1316_v14, %v1313_v35  ;;  %v2416_v57 = vpack.c.bf16 %v1315_v27, %v1312_v26  ;;  %v4064_v62 = vld [vmem:[#allocation9_spill] sm:$0xff]  ;;  %v4068_v38 = vpack.c.bf16 %v4066_v1, %v4067_v15  ;;  %v4069_v35 = vld [vmem:[#allocation50_spill] sm:$0xff]  ;;  %v4107_v1 = vld [vmem:[#allocation31_spill] sm:$0xff] }
 0x29f   : > { %v2705_v36 = vpop.eup %2704  ;;  %v4065_v19 = vpack.c.bf16 %v4063_v60, %v4064_v62  ;;  %v1360_v14 = vmul.f32 0.00390625, %v4069_v35  ;;  %v4071_v27 = vld [vmem:[#allocation14_spill] sm:$0xff]  ;;  %v4074_v26 = vld [vmem:[#allocation49_spill] sm:$0xff] }
 0x2a0   : > { %v1280_v28 = vpop.xlane.xlu1 %1279  ;;  %2415 = vmatprep.subr.bf16.mxu1 %v2414_v31  ;;  %v1319_v46 = vmul.f32 %v2705_v36, %v3666_v2  ;;  %v1318_v12 = vmul.f32 %v2705_v36, %v3664_v58  ;;  %v1348_v2 = vmul.f32 0.00390625, %v3724_v33  ;;  %v4046_v58 = vld [vmem:[#allocation38_spill] sm:$0xff]  ;;  %v4048_v33 = vld [vmem:[#allocation37_spill] sm:$0xff]  ;;  %v1359_v36 = vmul.f32 0.00390625, %v4074_v26 }
 0x2a1   : > { %1516 = vmatmul.mubr.f32.gmra.mrb[20].mxu1 %v1339_v32  ;;  %2710 = vrcp.f32 %v1280_v28  ;;  %v4072_v32 = vld [vmem:[#allocation13_spill] sm:$0xff] }
 0x2a2   : > { %1520 = vmatprep.mubr.f32.mxu1 %v1342_v41  ;;  %v4070_v41 = vld [vmem:[#allocation47_spill] sm:$0xff]  ;;  %v4073_v28 = vpack.c.bf16 %v4071_v27, %v4072_v32 }
 0x2a3   : > { %v2707_v37 = vpop.eup %2706  ;;  %v1357_v31 = vmul.f32 0.00390625, %v4070_v41 }
 0x2a4   : > { %v1322_v3 = vmul.f32 %v2707_v37, %v3674_v44  ;;  %v1321_v21 = vmul.f32 %v2707_v37, %v3672_v25  ;;  %v1350_v25 = vmul.f32 0.00390625, %v3728_v54  ;;  %v1354_v54 = vmul.f32 0.00390625, %v4051_v51  ;;  %v4094_v51 = vld [vmem:[#allocation24_spill] sm:$0xff] }
 0x2a5   : > { %1521 = vmatmul.mubr.f32.gmra.mrb[22].mxu1 %v1341_v29  ;;  %v4076_v29 = vld [vmem:[#allocation16_spill] sm:$0xff] }
 0x2a6   : > { %2417 = vmatpush1.bf16.xpose.msra.mxu1 %v2416_v57  ;;  %1525 = vmatprep.mubr.f32.mxu1 %v1344_v11  ;;  %v2418_v17 = vpack.c.bf16 %v1322_v3, %v1319_v46  ;;  %v2420_v30 = vpack.c.bf16 %v1321_v21, %v1318_v12  ;;  %v4075_v11 = vmov 0.0   ;;  %v4077_v46 = vld [vmem:[#allocation15_spill] sm:$0xff] }
 0x2a7   : > { %v2709_v16 = vpop.eup %2708  ;;  %v4078_v3 = vpack.c.bf16 %v4076_v29, %v4077_v46  ;;  %v2107_v29 = vld [vmem:[%s3957_s3] sm:$0xf] }
 0x2a8   : > { %2419 = vmatprep.subr.bf16.mxu1 %v2418_v17  ;;  %v1325_v39 = vmul.f32 %v2709_v16, %v3684_v47  ;;  %v1324_v59 = vmul.f32 %v2709_v16, %v4048_v33  ;;  %v4080_v17 = vld [vmem:[#allocation17_spill] sm:$0xff]  ;;  %v4082_v16 = vld [vmem:[#allocation20_spill] sm:$0xff]  ;;  %v2227_v46 = vld [vmem:[%s3958_s4] sm:$0xf] }
 0x2a9   : > { %1526 = vmatmul.mubr.f32.gmra.mrb[24].mxu1 %v1343_v7  ;;  %v4089_v33 = vld [vmem:[#allocation21_spill] sm:$0xff] }
 0x2aa   : > { %1595 = vmatprep.mubr.f32.mxu1 %v1346_v6  ;;  %v4079_v6 = vld [vmem:[#allocation18_spill] sm:$0xff] }
 0x2ab   : > { %v2711_v44 = vpop.eup %2710  ;;  %v4081_v21 = vpack.c.bf16 %v4079_v6, %v4080_v17 }
 0x2ac   : > { %v1328_v18 = vmul.f32 %v2711_v44, %v3694_v0  ;;  %v1327_v13 = vmul.f32 %v2711_v44, %v4046_v58  ;;  %v1349_v0 = vmul.f32 0.00390625, %v4050_v56  ;;  %v4085_v44 = vld [vmem:[#allocation26_spill] sm:$0xff] }
 0x2ad   : > { %1596 = vmatmul.mubr.f32.vlgmr.msra.gmra.mrb[26].mxu1 %v1345_v9  ;;  %v4086_v9 = vld [vmem:[#allocation25_spill] sm:$0xff] }
 0x2ae   : > { %2421 = vmatpush1.bf16.xpose.msra.mxu1 %v2420_v30  ;;  %1600 = vmatprep.mubr.f32.mxu1 %v1348_v2  ;;  %v2422_v24 = vpack.c.bf16 %v1328_v18, %v1325_v39  ;;  %v2424_v47 = vpack.c.bf16 %v1327_v13, %v1324_v59  ;;  %v4083_v2 = vld [vmem:[#allocation19_spill] sm:$0xff]  ;;  %v4087_v39 = vpack.c.bf16 %v4085_v44, %v4086_v9 }
 0x2af   : > { %v4084_v30 = vpack.c.bf16 %v4082_v16, %v4083_v2 }
 0x2b0   : > { %2423 = vmatprep.subr.bf16.mxu1 %v2422_v24 }
 0x2b1   : > { %1601 = vmatmul.mubr.f32.gmra.mrb[28].mxu1 %v1347_v22  ;;  %v4088_v22 = vld [vmem:[#allocation22_spill] sm:$0xff] }
 0x2b2   : > { %1605 = vmatprep.mubr.f32.mxu1 %v1350_v25  ;;  %v4090_v59 = vpack.c.bf16 %v4088_v22, %v4089_v33 }
 0x2b5   : > { %1606 = vmatmul.mubr.f32.gmra.mrb[30].mxu1 %v1349_v0 }
 0x2b6   : > { %2425 = vmatpush1.bf16.xpose.msra.mxu1 %v2424_v47  ;;  %1610 = vmatprep.mubr.f32.mxu1 %v1352_v23  ;;  %v4092_v23 = vld [vmem:[#allocation27_spill] sm:$0xff] }
 0x2b7   : > { %2427 = vmatprep.subr.bf16.mxu1 %v4055_v61  ;;  %v4093_v47 = vpack.c.bf16 %v4091_v20, %v4092_v23 }
 0x2b9   : > { %1611 = vmatmul.mubr.f32.gmra.mrb[32].mxu1 %v1351_v40  ;;  %v4097_v40 = vld [vmem:[#allocation34_spill] sm:$0xff] }
 0x2ba   : > { %1680 = vmatprep.mubr.f32.mxu1 %v1354_v54  ;;  %v4095_v54 = vld [vmem:[#allocation23_spill] sm:$0xff]  ;;  %v4099_v48 = vpack.c.bf16 %v4097_v40, %v4098_v45 }
 0x2bb   : > { %v4096_v49 = vpack.c.bf16 %v4094_v51, %v4095_v54 }
 0x2bd   : > { %1681 = vmatmul.mubr.f32.vlgmr.msra.gmra.mrb[34].mxu1 %v1353_v4 }
 0x2be   : > { %2429 = vmatpush1.bf16.msra.mxu1 %v4060_v5  ;;  %1685 = vmatprep.mubr.f32.mxu1 %v1356_v10  ;;  %v4101_v5 = vld [vmem:[#allocation29_spill] sm:$0xff] }
 0x2bf   : > { %2431 = vmatprep.subr.bf16.mxu1 %v4065_v19  ;;  %v4102_v50 = vpack.c.bf16 %v4100_v53, %v4101_v5  ;;  %v4106_v19 = vld [vmem:[#allocation32_spill] sm:$0xff] }
 0x2c0   : > { %v4108_v15 = vpack.c.bf16 %v4106_v19, %v4107_v1 }
 0x2c1   : > { %1686 = vmatmul.mubr.f32.gmra.mrb[36].mxu1 %v1355_v52 }
 0x2c2   : > { %2433 = vmatpush1.bf16.msra.mxu1 %v4068_v38  ;;  %1690 = vmatprep.mubr.f32.mxu1 %v1358_v34  ;;  %v4103_v34 = vld [vmem:[#allocation36_spill] sm:$0xff] }
 0x2c3   : > { %2435 = vmatprep.subr.bf16.mxu1 %v4073_v28  ;;  %v4105_v52 = vpack.c.bf16 %v4103_v34, %v4104_v42 }
 0x2c5   : > { %1691 = vmatmul.mubr.f32.gmra.mrb[38].mxu1 %v1357_v31 }
 0x2c6   : > { %1695 = vmatprep.mubr.f32.mxu1 %v1360_v14 }
 0x2c9   : > { %1696 = vmatmul.mubr.f32.gmra.mrb[40].mxu1 %v1359_v36 }
 0x2ca   : > { %1778 = vmatprep.mubr.f32.mxu1 %v4075_v11 }
 0x360   : > { %v1427_v57 = vpop.f32.mrb[10].mxu1 }
 0x361   : > { %2371 = vmatmul.mubr.msk.f32.vlgmr.msra.gmra.mrb[42].mxu1 %vm1701_vm2, %v1427_v57  ;;  %v1429_v37 = vpop.f32.mrb[11].mxu1 }
 0x362   : > { %2437 = vmatpush1.bf16.msra.mxu1 %v4078_v3  ;;  %1784 = vmatprep.mubr.f32.mxu1 %v4075_v11  ;;  %v2781_v3 = vmov 0  }
 0x363   : > { %2439 = vmatprep.subr.bf16.mxu1 %v4081_v21  ;;  %2533 = vset.pattern.permute.xlu0 %v2781_v3 }
 0x364   : > { %v1432_v7 = vpop.f32.mrb[12].mxu1  ;;  %2534 = vset.pattern.permute.xlu1 %v2781_v3  ;;  %2110 = vperm.xlu0 %2533, %v2107_v29  }
 0x365   : > { %2372 = vmatmul.mubr.msk.f32.gmra.mrb[44].mxu1 %vm1701_vm2, %v1432_v7  ;;  %v1434_v12 = vpop.f32.mrb[13].mxu1  ;;  %2230 = vperm.xlu1 %2534, %v2227_v46  }
 0x366   : > { %2441 = vmatpush1.bf16.msra.mxu1 %v4084_v30  ;;  %1790 = vmatprep.mubr.f32.mxu1 %v4075_v11 }
 0x367   : > { %2443 = vmatprep.subr.bf16.mxu1 %v4087_v39 }
 0x368   : > { %v1437_v18 = vpop.f32.mrb[14].mxu1 }
 0x369   : > { %2373 = vmatmul.mubr.msk.f32.gmra.mrb[46].mxu1 %vm1701_vm2, %v1437_v18  ;;  %v1439_v25 = vpop.f32.mrb[15].mxu1 }
 0x36a   : > { %1796 = vmatprep.mubr.f32.mxu1 %v4075_v11 }
 0x36c   : > { %v1442_v24 = vpop.f32.mrb[16].mxu1 }
 0x36d   : > { %2374 = vmatmul.mubr.msk.f32.gmra.mrb[48].mxu1 %vm1701_vm2, %v1442_v24  ;;  %v1444_v58 = vpop.f32.mrb[17].mxu1 }
 0x36e   : > { %1879 = vmatprep.mubr.f32.mxu1 %v4075_v11 }
 0x370   : > { %v1512_v13 = vpop.f32.mrb[18].mxu1 }
 0x371   : > { %2375 = vmatmul.mubr.msk.f32.vlgmr.msra.gmra.mrb[50].mxu1 %vm1701_vm2, %v1512_v13  ;;  %v1514_v8 = vpop.f32.mrb[19].mxu1 }
 0x372   : > { %2445 = vmatpush1.bf16.msra.mxu1 %v4090_v59  ;;  %1885 = vmatprep.mubr.f32.mxu1 %v4075_v11 }
 0x373   : > { %2447 = vmatprep.subr.bf16.mxu1 %v4093_v47 }
 0x374   : > { %v1517_v56 = vpop.f32.mrb[20].mxu1 }
 0x375   : > { %2376 = vmatmul.mubr.msk.f32.gmra.mrb[52].mxu1 %vm1701_vm2, %v1517_v56  ;;  %v1519_v0 = vpop.f32.mrb[21].mxu1 }
 0x376   : > { %2449 = vmatpush1.bf16.msra.mxu1 %v4096_v49  ;;  %1891 = vmatprep.mubr.f32.mxu1 %v4075_v11 }
 0x377   : > { %2451 = vmatprep.subr.bf16.mxu1 %v4099_v48 }
 0x378   : > { %v1522_v61 = vpop.f32.mrb[22].mxu1 }
 0x379   : > { %2377 = vmatmul.mubr.msk.f32.gmra.mrb[54].mxu1 %vm1701_vm2, %v1522_v61  ;;  %v1524_v63 = vpop.f32.mrb[23].mxu1 }
 0x37a   : > { %1897 = vmatprep.mubr.f32.mxu1 %v4075_v11 }
 0x37c   : > { %v1527_v10 = vpop.f32.mrb[24].mxu1 }
 0x37d   : > { %2378 = vmatmul.mubr.msk.f32.gmra.mrb[56].mxu1 %vm1701_vm2, %v1527_v10  ;;  %v1529_v55 = vpop.f32.mrb[25].mxu1 }
 0x37e   : > { %1980 = vmatprep.mubr.f32.mxu1 %v4075_v11 }
 0x380   : > { %v1597_v4 = vpop.f32.mrb[26].mxu1 }
 0x381   : > { %2379 = vmatmul.mubr.msk.f32.vlgmr.msra.gmra.mrb[58].mxu1 %vm1701_vm2, %v1597_v4  ;;  %v1599_v43 = vpop.f32.mrb[27].mxu1 }
 0x382   : > { %2453 = vmatpush1.bf16.msra.mxu1 %v4102_v50  ;;  %1986 = vmatprep.mubr.f32.mxu1 %v4075_v11 }
 0x383   : > { %2455 = vmatprep.subr.bf16.mxu1 %v4105_v52 }
 0x384   : > { %v1602_v60 = vpop.f32.mrb[28].mxu1 }
 0x385   : > { %2380 = vmatmul.mubr.msk.f32.gmra.mrb[60].mxu1 %vm1701_vm2, %v1602_v60  ;;  %v1604_v62 = vpop.f32.mrb[29].mxu1 }
 0x386   : > { %2457 = vmatpush1.bf16.msra.mxu1 %v4108_v15  ;;  %1992 = vmatprep.mubr.f32.mxu1 %v4075_v11  ;;  %v2106_v15 = vld [vmem:[%s3956_s2] sm:$0xf] }
 0x388   : > { %v1607_v38 = vpop.f32.mrb[30].mxu1 }
 0x389   : > { %2381 = vmatmul.mubr.msk.f32.gmra.mrb[62].mxu1 %vm1701_vm2, %v1607_v38  ;;  %v1609_v35 = vpop.f32.mrb[31].mxu1 }
 0x38a   : > { %1998 = vmatprep.mubr.f32.mxu1 %v4075_v11 }
 0x38c   : > { %v1612_v14 = vpop.f32.mrb[32].mxu1 }
 0x38d   : > { %2382 = vmatmul.mubr.msk.f32.gmra.mrb[64].mxu1 %vm1701_vm2, %v1612_v14  ;;  %v1614_v41 = vpop.f32.mrb[33].mxu1 }
 0x38e   : > { %2081 = vmatprep.mubr.f32.mxu1 %v4075_v11 }
 0x390   : > { %v1682_v31 = vpop.f32.mrb[34].mxu1 }
 0x391   : > { %2383 = vmatmul.mubr.msk.f32.vlgmr.msra.gmra.mrb[66].mxu1 %vm1701_vm2, %v1682_v31  ;;  %v1684_v27 = vpop.f32.mrb[35].mxu1 }
 0x392   : > { %2087 = vmatprep.mubr.f32.mxu1 %v4075_v11 }
 0x394   : > { %v1687_v32 = vpop.f32.mrb[36].mxu1 }
 0x395   : > { %2384 = vmatmul.mubr.msk.f32.gmra.mrb[68].mxu1 %vm1701_vm2, %v1687_v32  ;;  %v1689_v28 = vpop.f32.mrb[37].mxu1 }
 0x396   : > { %2093 = vmatprep.mubr.f32.mxu1 %v4075_v11 }
 0x398   : > { %v1692_v26 = vpop.f32.mrb[38].mxu1 }
 0x399   : > { %2385 = vmatmul.mubr.msk.f32.gmra.mrb[70].mxu1 %vm1701_vm2, %v1692_v26  ;;  %v1694_v36 = vpop.f32.mrb[39].mxu1 }
 0x39a   : > { %2099 = vmatprep.mubr.f32.mxu1 %v4075_v11 }
 0x39c   : > { %v1697_v57 = vpop.f32.mrb[40].mxu1 }
 0x39d   : > { %2386 = vmatmul.mubr.msk.f32.gmra.mrb[72].mxu1 %vm1701_vm2, %v1697_v57  ;;  %v1699_v37 = vpop.f32.mrb[41].mxu1 }
 0x39e   : > { %2177 = vmatprep.mubr.f32.mxu1 %v4075_v11 }
 0x3e3   : > { %v2111_v38 = vpop.permute.xlu0 %2110 }
 0x434   : > { %v1780_v6 = vpop.f32.mrb[42].mxu1 }
 0x435   : > { %v1782_v17 = vpop.f32.mrb[43].mxu1 }
 0x438   : > { %v1786_v21 = vpop.f32.mrb[44].mxu1 }
 0x439   : > { %v2460_v7 = vpack.c.bf16 %v1786_v21, %v1780_v6  ;;  %v1788_v12 = vpop.f32.mrb[45].mxu1 }
 0x43a   : > { %v2458_v16 = vpack.c.bf16 %v1788_v12, %v1782_v17 }
 0x43c   : > { %2459 = vmatprep.subr.bf16.mxu1 %v2458_v16  ;;  %v1792_v11 = vpop.f32.mrb[46].mxu1 }
 0x43d   : > { %2461 = vmatpush1.bf16.msra.mxu1 %v2460_v7  ;;  %v1794_v2 = vpop.f32.mrb[47].mxu1 }
 0x440   : > { %v1798_v30 = vpop.f32.mrb[48].mxu1 }
 0x441   : > { %v2464_v44 = vpack.c.bf16 %v1798_v30, %v1792_v11  ;;  %v1800_v9 = vpop.f32.mrb[49].mxu1 }
 0x442   : > { %v2462_v39 = vpack.c.bf16 %v1800_v9, %v1794_v2 }
 0x444   : > { %2463 = vmatprep.subr.bf16.mxu1 %v2462_v39  ;;  %v1881_v18 = vpop.f32.mrb[50].mxu1 }
 0x445   : > { %2465 = vmatpush1.bf16.msra.mxu1 %v2464_v44  ;;  %v1883_v25 = vpop.f32.mrb[51].mxu1 }
 0x448   : > { %v1887_v24 = vpop.f32.mrb[52].mxu1 }
 0x449   : > { %v2468_v58 = vpack.c.bf16 %v1887_v24, %v1881_v18  ;;  %v1889_v13 = vpop.f32.mrb[53].mxu1 }
 0x44a   : > { %v2466_v8 = vpack.c.bf16 %v1889_v13, %v1883_v25 }
 0x44c   : > { %2467 = vmatprep.subr.bf16.mxu1 %v2466_v8  ;;  %v1893_v22 = vpop.f32.mrb[54].mxu1 }
 0x44d   : > { %2469 = vmatpush1.bf16.msra.mxu1 %v2468_v58  ;;  %v1895_v33 = vpop.f32.mrb[55].mxu1 }
 0x450   : > { %v1899_v59 = vpop.f32.mrb[56].mxu1 }
 0x451   : > { %v2472_v20 = vpack.c.bf16 %v1899_v59, %v1893_v22  ;;  %v1901_v23 = vpop.f32.mrb[57].mxu1 }
 0x452   : > { %v2470_v47 = vpack.c.bf16 %v1901_v23, %v1895_v33 }
 0x454   : > { %2471 = vmatprep.subr.bf16.mxu1 %v2470_v47  ;;  %v1982_v56 = vpop.f32.mrb[58].mxu1 }
 0x455   : > { %2473 = vmatpush1.bf16.msra.mxu1 %v2472_v20  ;;  %v1984_v0 = vpop.f32.mrb[59].mxu1 }
 0x458   : > { %v1988_v51 = vpop.f32.mrb[60].mxu1 }
 0x459   : > { %v2476_v54 = vpack.c.bf16 %v1988_v51, %v1982_v56  ;;  %v1990_v49 = vpop.f32.mrb[61].mxu1 }
 0x45a   : > { %v2474_v40 = vpack.c.bf16 %v1990_v49, %v1984_v0 }
 0x45c   : > { %2475 = vmatprep.subr.bf16.mxu1 %v2474_v40  ;;  %v1994_v45 = vpop.f32.mrb[62].mxu1  ;;  %v2231_v40 = vpop.permute.xlu1 %2230 }
 0x45d   : > { %2477 = vmatpush1.bf16.msra.mxu1 %v2476_v54  ;;  %v1996_v48 = vpop.f32.mrb[63].mxu1 }
 0x460   : > { %v2000_v61 = vpop.f32.mrb[64].mxu1 }
 0x461   : > { %v2480_v63 = vpack.c.bf16 %v2000_v61, %v1994_v45  ;;  %v2002_v10 = vpop.f32.mrb[65].mxu1 }
 0x462   : > { %v2478_v55 = vpack.c.bf16 %v2002_v10, %v1996_v48 }
 0x464   : > { %2479 = vmatprep.subr.bf16.mxu1 %v2478_v55  ;;  %v2083_v4 = vpop.f32.mrb[66].mxu1 }
 0x465   : > { %2481 = vmatpush1.bf16.msra.mxu1 %v2480_v63  ;;  %v2085_v43 = vpop.f32.mrb[67].mxu1 }
 0x468   : > { %v2089_v53 = vpop.f32.mrb[68].mxu1 }
 0x469   : > { %v2484_v5 = vpack.c.bf16 %v2089_v53, %v2083_v4  ;;  %v2091_v50 = vpop.f32.mrb[69].mxu1 }
 0x46a   : > { %v2482_v34 = vpack.c.bf16 %v2091_v50, %v2085_v43 }
 0x46c   : > { %2483 = vmatprep.subr.bf16.mxu1 %v2482_v34  ;;  %v2095_v42 = vpop.f32.mrb[70].mxu1 }
 0x46d   : > { %2485 = vmatpush1.bf16.msra.mxu1 %v2484_v5  ;;  %v2097_v52 = vpop.f32.mrb[71].mxu1 }
 0x470   : > { %v2101_v60 = vpop.f32.mrb[72].mxu1 }
 0x471   : > { %v2488_v62 = vpack.c.bf16 %v2101_v60, %v2095_v42  ;;  %v2103_v19 = vpop.f32.mrb[73].mxu1 }
 0x472   : > { %v2486_v1 = vpack.c.bf16 %v2103_v19, %v2097_v52 }
 0x474   : > { %2487 = vmatprep.subr.bf16.mxu1 %v2486_v1 }
 0x475   : > { %2489 = vmatpush1.bf16.msra.mxu1 %v2488_v62 }
 0x478   : > { %2178 = vmatmul.mubr.f32.vlgmr.msra.gmra.mrb[74].mxu1 %v2106_v15 }
 0x54b   : > { %v2179_v35 = vpop.f32.mrb[74].mxu1 }
 0x54c   : > { %v2180_v14 = vadd.f32 %v2179_v35, %v2111_v38  ;;  %v2181_v41 = vpop.f32.mrb[75].mxu1 }
 0x54d   : > { %v2182_v31 = vadd.f32 %v2181_v41, %v2111_v38 }
 0x54e   : > { %v2184_v27 = vsel %vm419_vm0, %v2180_v14, 0.0 }
 0x54f   : > { %v2185_v32 = vrot.slane %v2184_v27, 4  ;;  %v2191_v28 = vsel %vm419_vm0, %v2182_v31, 0.0 }
 0x550   : > { %v2192_v26 = vrot.slane %v2191_v28, 4 }
 0x551   : > { %v2186_v36 = vadd.f32 %v2185_v32, %v2184_v27 }
 0x552   : > { %v2193_v57 = vadd.f32 %v2192_v26, %v2191_v28 }
 0x553   : > { %v2187_v37 = vrot.slane %v2186_v36, 2 }
 0x554   : > { %v2194_v29 = vrot.slane %v2193_v57, 2 }
 0x555   : > { %v2188_v46 = vadd.f32 %v2187_v37, %v2186_v36 }
 0x556   : > { %v2195_v3 = vadd.f32 %v2194_v29, %v2193_v57 }
 0x557   : > { %v2189_v6 = vrot.slane %v2188_v46, 1 }
 0x558   : > { %v2196_v17 = vrot.slane %v2195_v3, 1 }
 0x559   : > { %v2190_v21 = vadd.f32 %v2189_v6, %v2188_v46 }
 0x55a   : > { %v2197_v7 = vadd.f32 %v2196_v17, %v2195_v3 }
 0x55b   : > { %v2199_v12 = vmul.f32 0.25, %v2190_v21 }
 0x55c   : > { %v2200_v16 = vmul.f32 0.25, %v2197_v7 }
 0x55d   : > { %v2201_v11 = vsub.f32 %v2180_v14, %v2199_v12 }
 0x55e   : > { %v2202_v2 = vsub.f32 %v2182_v31, %v2200_v16 }
 0x55f   : > { %v2203_v30 = vmul.f32 %v2201_v11, %v2201_v11 }
 0x560   : > { %v2204_v44 = vmul.f32 %v2202_v2, %v2202_v2 }
 0x561   : > { %v2205_v9 = vsel %vm419_vm0, %v2203_v30, 0.0 }
 0x562   : > { %v2206_v39 = vrot.slane %v2205_v9, 4  ;;  %v2212_v18 = vsel %vm419_vm0, %v2204_v44, 0.0 }
 0x563   : > { %v2213_v25 = vrot.slane %v2212_v18, 4 }
 0x564   : > { %v2207_v24 = vadd.f32 %v2206_v39, %v2205_v9 }
 0x565   : > { %v2214_v58 = vadd.f32 %v2213_v25, %v2212_v18 }
 0x566   : > { %v2208_v13 = vrot.slane %v2207_v24, 2 }
 0x567   : > { %v2215_v8 = vrot.slane %v2214_v58, 2 }
 0x568   : > { %v2209_v22 = vadd.f32 %v2208_v13, %v2207_v24 }
 0x569   : > { %v2216_v33 = vadd.f32 %v2215_v8, %v2214_v58 }
 0x56a   : > { %v2210_v59 = vrot.slane %v2209_v22, 1 }
 0x56b   : > { %v2217_v20 = vrot.slane %v2216_v33, 1 }
 0x56c   : > { %v2211_v23 = vadd.f32 %v2210_v59, %v2209_v22 }
 0x56d   : > { %v2218_v47 = vadd.f32 %v2217_v20, %v2216_v33 }
 0x56e   : > { %v2219_v56 = vmul.f32 0.25, %v2211_v23 }
 0x56f   : > { %v2220_v0 = vmul.f32 0.25, %v2218_v47 }
 0x570   : > { %v2221_v51 = vadd.f32 1e-05, %v2219_v56 }
 0x571   : > { %v2222_v54 = vadd.f32 1e-05, %v2220_v0 }
 0x572   : > { %2712 = vrsqrt.f32 %v2221_v51 }
 0x573   : > { %2714 = vrsqrt.f32 %v2222_v54 }
 0x57c   : > { %v2713_v49 = vpop.eup %2712 }
 0x57d   : > { %v2715_v45 = vpop.eup %2714  ;;  %v2225_v48 = vmul.f32 %v2713_v49, %v2201_v11 }
 0x57e   : > { %v2226_v61 = vmul.f32 %v2715_v45, %v2202_v2 }
 0x57f   : > { %v2233_v63 = vmul.f32 %v2231_v40, %v2225_v48 }
 0x580   : > { %v2234_v10 = vmul.f32 %v2231_v40, %v2226_v61 }
 0x582   : > { %v2237_v55 = vcombine.low %v2233_v63, %v2234_v10 }
 0x584   : > { %2239 = vst [vmem:[%s217_s25] sm:$0xff] %v2237_v55 }
 0x585   : > { %2729 = shalt.err (!%p2726_p3)
}
 0x586   : > { %s2730_s12 = scalar_lea.hbm %s3912_s7, 128  ;;  %s2734_s15 = scalar_lea.hbm %s3959_s5, 256 }
 0x587   : > { %p2731_p4 = scmp.ne.s32.totalorder %s3912_s7, %s2730_s12  ;;  %p2735_p9 = scmp.lt.u32.totalorder %s3912_s7, %s3959_s5 }
 0x588   : > { %p2736_p10 = scmp.lt.u32.totalorder %s2734_s15, %s2730_s12  ;;  %p2738_p12 = scmp.lt.u32.totalorder %s2730_s12, %s3912_s7 }
 0x589   : > { %p2732_p7 = pnand %p2731_p4, %p2851_p5 }
 0x58a   : > { %p2737_p11 = por %p2736_p10, %p2735_p9 }
 0x58b   : > { %p2733_p8 = pneg %p2732_p7 }
 0x58c   : > { %p2739_p13 = por %p2738_p12, %p2737_p11 }
 0x58e   : > { %p2740_p0 = pnand %p2739_p13, %p2733_p8 }
 0x590   : > { %2743 = shalt.err (!%p2740_p0)
}
 0x591   : > { %2492 = dma.vmem_to_hbm [thread:$0]  (%p2851_p5), %s3914_s26, 128, %s3912_s7, %s2241_s8  }
 0x592 PF: > { %p2498_p1 = scmp.ge.s32.totalorder %s2778_s21, 2  ;;  %s2267_s23 = sand.u32 1, %s2766_s18  }
 0x593   : > { %s2268_s25 = scalar_lea.sflag [#allocation3], %s2267_s23 }
 0x594   : > { %p2495_p2 = pnand %p2498_p1, %p2855_p6 }
 0x596   : > { %2761 = dma.done.wait (!%p2495_p2), %s2268_s25, 128  }
 0x597   : > { %2763 = vsyncadd (!%p2495_p2), %s2268_s25, 4294967168  ;;  %p15_p3 = scmp.ge.s32.totalorder %s2838_s24, 4   ;;  %s4109_s18 = smov %s2770_s19 }
 0x598   : > { %s4110_s19 = smov %s2774_s20  ;;  %s4111_s20 = smov %s2849_s27 }
 0x599   : > { %s4112_s21 = smov %s2838_s24  ;;  %17 = sbr.rel (!%p15_p3) target bundleno = 3 (0x3), region = 75 }
 0x5a0   :  { %2273 = vsyncpa [#allocation3], 1 }
 0x5a1   :  { %2275 = vsyncpa [#allocation3 + $0x1], 1 }

</bundles_post_ra>
